<compile_context>
chip_gen: v7x
topology: tpu7x:2x2x1
jax: 0.10.0
libtpu: 0.0.40
codegen_flags: <defaults>
</compile_context>

<pallas_src>
import functools

import jax
import jax.numpy as jnp
from jax.experimental import pallas as pl
from jax.experimental.pallas import tpu as pltpu


# ----------------------------------------------------------------------------
# Fused kernel
# ----------------------------------------------------------------------------
def encoder_kernel(p_ref, cw_ref, cb_ref, pw_ref, pb_ref, o_ref, acc_ref, *,
                   inv_hw, hw, thw, n_lane_groups, mask_last):
    # p_ref  : (1, Kp_pad, thw) bf16/f32  patch tile (lane-dense over HW)
    # cw_ref : (F, Kp_pad)      bf16/f32  conv weight, transposed
    # cb_ref : (F, 1)           f32       conv bias (column)
    # pw_ref : (E, F)           f32       BN-folded projection weight, transposed
    # pb_ref : (E, 1)           f32       BN-folded projection bias (column)
    # o_ref  : (1, E, 1)        f32       embedding column for image b
    # acc_ref: (F, 128)         f32       lane-group pooled-sum accumulator
    k = pl.program_id(1)

    @pl.when(k == 0)
    def _init():
        acc_ref[...] = jnp.zeros_like(acc_ref)

    # Conv as matmul on the MXU (f32 accumulation); bias + ReLU on the VPU.
    acts = jnp.dot(cw_ref[...], p_ref[0],
                   preferred_element_type=jnp.float32)            # (F, thw)
    acts = jnp.maximum(acts + cb_ref[...], 0.0)

    if mask_last:
        # cdiv grid: zero the out-of-range HW columns of the last tile before
        # they reach the pooled sum (OOB block region is undefined data).
        col = jax.lax.broadcasted_iota(jnp.int32, acts.shape, 1) + k * thw
        acts = jnp.where(col < hw, acts, 0.0)

    # Pure-VPU partial pooling: fold thw lanes into 128 lane groups with
    # element-wise vreg adds; the cross-lane (XLU) reduce is deferred to the
    # finalize branch (runs once per image).
    partial = acts[:, 0:128]
    for j in range(1, n_lane_groups):
        partial = partial + acts[:, j * 128:(j + 1) * 128]
    acc_ref[...] += partial

    @pl.when(k == pl.num_programs(1) - 1)
    def _finalize():
        # Project first, then the single cross-lane reduce (linearity:
        #   pw @ sum_l acc[:, l]  ==  sum_l (pw @ acc)[:, l]).
        proj = jnp.dot(pw_ref[...], acc_ref[...],
                       preferred_element_type=jnp.float32)        # (E, 128)
        y = jnp.sum(proj, axis=1, keepdims=True) * inv_hw + pb_ref[...]
        o_ref[0, :, :] = jnp.maximum(y, 0.0)   # ReLU; Dropout identity (eval)


# ----------------------------------------------------------------------------
# im2col (3x3, stride 1, pad 1) -> lane-dense [B, Kp(_pad), H*W]
# ----------------------------------------------------------------------------
def im2col_3x3_t(x, kp_pad=None, dtype=None):
    """Zero-pad rows (Kp -> kp_pad) are built into the single concatenate, so
    no second full-tensor pad copy is materialized in HBM."""
    B, C, H, W = x.shape
    dtype = dtype or x.dtype
    xp = jnp.pad(x, ((0, 0), (0, 0), (1, 1), (1, 1)))
    taps = [xp[:, :, di:di + H, dj:dj + W].reshape(B, C, H * W).astype(dtype)
            for di in range(3) for dj in range(3)]
    if kp_pad is not None and kp_pad > 9 * C:
        taps.append(jnp.zeros((B, kp_pad - 9 * C, H * W), dtype))
    return jnp.concatenate(taps, axis=1)                          # (B, Kp*, HW)


def _pick_thw(hw, feat, acts_cap_bytes=8 * 2**20):
    """Largest HW tile: multiple of 128, <= 2048, (feat, thw) f32 acts <= cap."""
    hw_ceil = pl.cdiv(hw, 128) * 128
    for cand in (2048, 1024, 512, 256, 128):
        if cand <= max(hw_ceil, 128) and feat * cand * 4 <= acts_cap_bytes:
            return cand
    return 128


# ----------------------------------------------------------------------------
# EncoderCNN forward (single pallas_call)
# ----------------------------------------------------------------------------
def encoder_cnn_forward(images, params, *, thw=None, eps=1e-5,
                        compute_dtype=jnp.bfloat16):
    B, C, H, W = images.shape
    HW = H * W
    Kp = C * 9
    Kp_pad = ((Kp + 31) // 32) * 32        # clean sublane packing (f32 & bf16)

    F = params["conv_w"].shape[1]
    E = params["lin_w"].shape[1]

    if thw is None:
        thw = _pick_thw(HW, F)
    assert thw % 128 == 0, "HW tile must be a multiple of the 128-lane width"
    n_hw_tiles = pl.cdiv(HW, thw)
    mask_last = (HW % thw) != 0

    # Lane-dense patches [B, Kp_pad, HW] in the compute dtype (bf16 default).
    patches = im2col_3x3_t(images, kp_pad=Kp_pad, dtype=compute_dtype)

    # Conv weights: pad + transpose the tiny weight, cast to compute dtype.
    cw_t = jnp.pad(params["conv_w"],
                   ((0, Kp_pad - Kp), (0, 0))).T.astype(compute_dtype)  # (F,Kp_pad)
    cb_col = params["conv_b"].reshape(F, 1).astype(jnp.float32)

    # Fold BatchNorm1d (eval / running stats) into the projection; keep f32.
    scale = params["bn_g"] * jax.lax.rsqrt(params["bn_var"] + eps)       # (1, E)
    pw_t = (params["lin_w"] * scale).T.astype(jnp.float32)               # (E, F)
    pb_col = ((params["lin_b"] - params["bn_mu"]) * scale
              + params["bn_b"]).reshape(E, 1).astype(jnp.float32)

    kernel = functools.partial(
        encoder_kernel, inv_hw=1.0 / HW, hw=HW, thw=thw,
        n_lane_groups=thw // 128, mask_last=mask_last)

    # Explicit VMEM budget (double-buffered streams + resident weights +
    # activation tile + accumulator), clamped for v7x's 64 MiB VMEM.
    bpe = jnp.dtype(compute_dtype).itemsize
    est = (2 * Kp_pad * thw * bpe                  # patch tile x2 buffers
           + 2 * (F * Kp_pad * bpe + F * 4)        # conv weight / bias
           + 2 * (E * F * 4 + E * 4)               # projection weight / bias
           + F * thw * 4                           # (F, thw) activation tile
           + F * 128 * 4                           # accumulator scratch
           + 2 * E * 4)                            # output block
    vmem_limit = int(min(max(2 * est, 32 * 2**20), 64 * 2**20))

    out = pl.pallas_call(
        kernel,
        out_shape=jax.ShapeDtypeStruct((B, E, 1), jnp.float32),
        grid=(B, n_hw_tiles),
        in_specs=[
            pl.BlockSpec((1, Kp_pad, thw), lambda b, k: (b, 0, k)),
            pl.BlockSpec((F, Kp_pad), lambda b, k: (0, 0)),
            pl.BlockSpec((F, 1), lambda b, k: (0, 0)),
            pl.BlockSpec((E, F), lambda b, k: (0, 0)),
            pl.BlockSpec((E, 1), lambda b, k: (0, 0)),
        ],
        out_specs=pl.BlockSpec((1, E, 1), lambda b, k: (b, 0, 0)),
        scratch_shapes=[pltpu.VMEM((F, 128), jnp.float32)],
        compiler_params=pltpu.CompilerParams(
            dimension_semantics=("parallel", "arbitrary"),
            vmem_limit_bytes=vmem_limit),
    )(patches, cw_t, cb_col, pw_t, pb_col)
    return out.reshape(B, E)


# ----------------------------------------------------------------------------
# Parameters & pure-JAX f32 reference
# ----------------------------------------------------------------------------
def init_params(key, cin=3, in_features=256, embed_size=128):
    ks = jax.random.split(key, 6)
    kp = cin * 9
    conv_w = (jax.random.normal(ks[0], (kp, in_features), jnp.float32)
              * (1.0 / jnp.sqrt(kp)))
    conv_b = jax.random.normal(ks[1], (1, in_features), jnp.float32) * 0.01
    lin_w = (jax.random.normal(ks[2], (in_features, embed_size), jnp.float32)
             * (1.0 / jnp.sqrt(in_features)))
    lin_b = jax.random.normal(ks[3], (1, embed_size), jnp.float32) * 0.01
    bn_g = 1.0 + 0.1 * jax.random.normal(ks[4], (1, embed_size), jnp.float32)
    bn_b = 0.1 * jax.random.normal(ks[5], (1, embed_size), jnp.float32)
    bn_mu = jnp.zeros((1, embed_size), jnp.float32)
    bn_var = jnp.ones((1, embed_size), jnp.float32)
    return dict(conv_w=conv_w, conv_b=conv_b, lin_w=lin_w, lin_b=lin_b,
                bn_g=bn_g, bn_b=bn_b, bn_mu=bn_mu, bn_var=bn_var)


def reference_forward(images, p, eps=1e-5):
    patches = im2col_3x3_t(images)                                 # (B, Kp, HW)
    acts = jnp.einsum("bkh,kf->bhf", patches, p["conv_w"])
    acts = jnp.maximum(acts + p["conv_b"][None], 0.0)              # (B, HW, F)
    feats = jnp.mean(acts, axis=1)                                 # (B, F)
    y = feats @ p["lin_w"] + p["lin_b"]
    y = (y - p["bn_mu"]) * jax.lax.rsqrt(p["bn_var"] + eps)
    y = y * p["bn_g"] + p["bn_b"]
    return jnp.maximum(y, 0.0)


if __name__ == "__main__":
    key = jax.random.PRNGKey(0)
    k_img, k_par = jax.random.split(key)

    B, C, H, W = 2, 3, 32, 32
    in_features, embed_size = 256, 128

    images = jax.random.normal(k_img, (B, C, H, W), jnp.float32)
    params = init_params(k_par, cin=C, in_features=in_features,
                         embed_size=embed_size)

    ref = reference_forward(images, params)

    # 1) Flagship config: bf16 patch/weight stream, auto tile (single HW tile).
    out = jax.block_until_ready(encoder_cnn_forward(images, params))
    assert out.shape == (B, embed_size)
    assert jnp.allclose(out, ref, atol=2e-2, rtol=2e-2), \
        float(jnp.max(jnp.abs(out - ref)))

    # 2) f32 path with a non-divisible HW tile: exercises the multi-tile
    #    accumulator and the masked last tile with exact arithmetic.
    out32 = jax.block_until_ready(
        encoder_cnn_forward(images, params, thw=384,
                            compute_dtype=jnp.float32))
    assert jnp.allclose(out32, ref, atol=1e-4, rtol=1e-4), \
        float(jnp.max(jnp.abs(out32 - ref)))

    print("KERNEL_OK")
</pallas_src>

<mosaic_0001>
module attributes {stable_mosaic.version = 11 : i64} {
  func.func @encoder_kernel(%arg0: i32, %arg1: i32, %arg2: memref<1x32x1024xbf16, #tpu.memory_space<vmem>>, %arg3: memref<256x32xbf16, #tpu.memory_space<vmem>>, %arg4: memref<256x1xf32, #tpu.memory_space<vmem>>, %arg5: memref<128x256xf32, #tpu.memory_space<vmem>>, %arg6: memref<128x1xf32, #tpu.memory_space<vmem>>, %arg7: memref<1x128x1xf32, #tpu.memory_space<vmem>>, %arg8: memref<256x128xf32, #tpu.memory_space<vmem>>) attributes {dimension_semantics = [#tpu.dimension_semantics<parallel>, #tpu.dimension_semantics<arbitrary>], iteration_bounds = array<i64: 2, 1>, scalar_prefetch = 0 : i64, scratch_operands = 1 : i64, tpu.core_type = #tpu.core_type<tc>, window_params = [{transform_indices = @transform_0, window_bounds = array<i64: 1, 32, 1024>}, {pipeline_mode = #tpu.pipeline_mode<synchronous>, transform_indices = @transform_1, window_bounds = array<i64: 256, 32>}, {pipeline_mode = #tpu.pipeline_mode<synchronous>, transform_indices = @transform_2, window_bounds = array<i64: 256, 1>}, {pipeline_mode = #tpu.pipeline_mode<synchronous>, transform_indices = @transform_3, window_bounds = array<i64: 128, 256>}, {pipeline_mode = #tpu.pipeline_mode<synchronous>, transform_indices = @transform_4, window_bounds = array<i64: 128, 1>}, {transform_indices = @transform_5, window_bounds = array<i64: 1, 128, 1>}]} {
    %c0_i32 = arith.constant 0 : i32
    %0 = arith.cmpi eq, %arg1, %c0_i32 : i32
    %1 = arith.extui %0 : i1 to i32
    %c0_i32_0 = arith.constant 0 : i32
    %2 = arith.cmpi ne, %1, %c0_i32_0 : i32
    scf.if %2 {
      %cst_14 = arith.constant 0.000000e+00 : f32
      %33 = vector.broadcast %cst_14 : f32 to vector<256x128xf32>
      %c0_15 = arith.constant 0 : index
      %c0_16 = arith.constant 0 : index
      %34 = vector.load %arg8[%c0_15, %c0_16] : memref<256x128xf32, #tpu.memory_space<vmem>>, vector<256x128xf32>
      tpu.vector_store %arg8[%c0_15, %c0_16], %33 {strides = array<i32>} : memref<256x128xf32, #tpu.memory_space<vmem>>, vector<256x128xf32>,
    } else {
    }
    %c0 = arith.constant 0 : index
    %c0_1 = arith.constant 0 : index
    %3 = vector.load %arg3[%c0, %c0_1] : memref<256x32xbf16, #tpu.memory_space<vmem>>, vector<256x32xbf16>
    %c0_2 = arith.constant 0 : index
    %c0_3 = arith.constant 0 : index
    %c0_4 = arith.constant 0 : index
    %4 = vector.load %arg2[%c0_2, %c0_3, %c0_4] : memref<1x32x1024xbf16, #tpu.memory_space<vmem>>, vector<1x32x1024xbf16>
    %5 = vector.shape_cast %4 : vector<1x32x1024xbf16> to vector<32x1024xbf16>
    %cst = arith.constant dense<0.000000e+00> : vector<256x1024xf32>
    %6 = tpu.matmul %3, %5, %cst {dimension_numbers = #tpu.dot_dimension_numbers<[1], [0], [0], [1], [0, 0, 1, 1], [], []>} : vector<256x32xbf16>, vector<32x1024xbf16>, vector<256x1024xf32> -> vector<256x1024xf32>
    %c0_5 = arith.constant 0 : index
    %c0_6 = arith.constant 0 : index
    %7 = vector.load %arg4[%c0_5, %c0_6] : memref<256x1xf32, #tpu.memory_space<vmem>>, vector<256x1xf32>
    %8 = vector.broadcast %7 : vector<256x1xf32> to vector<256x1024xf32>
    %9 = arith.addf %6, %8 : vector<256x1024xf32>
    %cst_7 = arith.constant 0.000000e+00 : f32
    %10 = vector.broadcast %cst_7 : f32 to vector<256x1024xf32>
    %11 = arith.maximumf %9, %10 : vector<256x1024xf32>
    %12 = vector.extract_strided_slice %11 {offsets = [0, 0], sizes = [256, 128], strides = [1, 1]} : vector<256x1024xf32> to vector<256x128xf32>
    %13 = vector.extract_strided_slice %11 {offsets = [0, 128], sizes = [256, 128], strides = [1, 1]} : vector<256x1024xf32> to vector<256x128xf32>
    %14 = arith.addf %12, %13 : vector<256x128xf32>
    %15 = vector.extract_strided_slice %11 {offsets = [0, 256], sizes = [256, 128], strides = [1, 1]} : vector<256x1024xf32> to vector<256x128xf32>
    %16 = arith.addf %14, %15 : vector<256x128xf32>
    %17 = vector.extract_strided_slice %11 {offsets = [0, 384], sizes = [256, 128], strides = [1, 1]} : vector<256x1024xf32> to vector<256x128xf32>
    %18 = arith.addf %16, %17 : vector<256x128xf32>
    %19 = vector.extract_strided_slice %11 {offsets = [0, 512], sizes = [256, 128], strides = [1, 1]} : vector<256x1024xf32> to vector<256x128xf32>
    %20 = arith.addf %18, %19 : vector<256x128xf32>
    %21 = vector.extract_strided_slice %11 {offsets = [0, 640], sizes = [256, 128], strides = [1, 1]} : vector<256x1024xf32> to vector<256x128xf32>
    %22 = arith.addf %20, %21 : vector<256x128xf32>
    %23 = vector.extract_strided_slice %11 {offsets = [0, 768], sizes = [256, 128], strides = [1, 1]} : vector<256x1024xf32> to vector<256x128xf32>
    %24 = arith.addf %22, %23 : vector<256x128xf32>
    %25 = vector.extract_strided_slice %11 {offsets = [0, 896], sizes = [256, 128], strides = [1, 1]} : vector<256x1024xf32> to vector<256x128xf32>
    %26 = arith.addf %24, %25 : vector<256x128xf32>
    %c0_8 = arith.constant 0 : index
    %c0_9 = arith.constant 0 : index
    %27 = vector.load %arg8[%c0_8, %c0_9] : memref<256x128xf32, #tpu.memory_space<vmem>>, vector<256x128xf32>
    %28 = arith.addf %27, %26 : vector<256x128xf32>
    %c0_10 = arith.constant 0 : index
    %c0_11 = arith.constant 0 : index
    %29 = vector.load %arg8[%c0_10, %c0_11] : memref<256x128xf32, #tpu.memory_space<vmem>>, vector<256x128xf32>
    tpu.vector_store %arg8[%c0_10, %c0_11], %28 {strides = array<i32>} : memref<256x128xf32, #tpu.memory_space<vmem>>, vector<256x128xf32>,
    %c0_i32_12 = arith.constant 0 : i32
    %30 = arith.cmpi eq, %arg1, %c0_i32_12 : i32
    %31 = arith.extui %30 : i1 to i32
    %c0_i32_13 = arith.constant 0 : i32
    %32 = arith.cmpi ne, %31, %c0_i32_13 : i32
    scf.if %32 {
      %c0_14 = arith.constant 0 : index
      %c0_15 = arith.constant 0 : index
      %33 = vector.load %arg5[%c0_14, %c0_15] : memref<128x256xf32, #tpu.memory_space<vmem>>, vector<128x256xf32>
      %c0_16 = arith.constant 0 : index
      %c0_17 = arith.constant 0 : index
      %34 = vector.load %arg8[%c0_16, %c0_17] : memref<256x128xf32, #tpu.memory_space<vmem>>, vector<256x128xf32>
      %cst_18 = arith.constant dense<0.000000e+00> : vector<128x128xf32>
      %35 = tpu.matmul %33, %34, %cst_18 {dimension_numbers = #tpu.dot_dimension_numbers<[1], [0], [0], [1], [0, 0, 1, 1], [], []>} : vector<128x256xf32>, vector<256x128xf32>, vector<128x128xf32> -> vector<128x128xf32>
      %cst_19 = arith.constant dense<0.000000e+00> : vector<128xf32>
      %36 = vector.multi_reduction <add>, %35, %cst_19 [1] : vector<128x128xf32> to vector<128xf32>
      %37 = vector.shape_cast %36 : vector<128xf32> to vector<128x1xf32>
      %cst_20 = arith.constant 9.765625E-4 : f32
      %38 = vector.broadcast %cst_20 : f32 to vector<128x1xf32>
      %39 = arith.mulf %37, %38 : vector<128x1xf32>
      %c0_21 = arith.constant 0 : index
      %c0_22 = arith.constant 0 : index
      %40 = vector.load %arg6[%c0_21, %c0_22] : memref<128x1xf32, #tpu.memory_space<vmem>>, vector<128x1xf32>
      %41 = arith.addf %39, %40 : vector<128x1xf32>
      %cst_23 = arith.constant 0.000000e+00 : f32
      %42 = vector.broadcast %cst_23 : f32 to vector<128x1xf32>
      %43 = arith.maximumf %41, %42 : vector<128x1xf32>
      %c0_24 = arith.constant 0 : index
      %c0_25 = arith.constant 0 : index
      %c0_26 = arith.constant 0 : index
      %44 = vector.load %arg7[%c0_24, %c0_25, %c0_26] : memref<1x128x1xf32, #tpu.memory_space<vmem>>, vector<1x128x1xf32>
      %45 = vector.shape_cast %44 : vector<1x128x1xf32> to vector<128x1xf32>
      %46 = vector.shape_cast %43 : vector<128x1xf32> to vector<1x128x1xf32>
      tpu.vector_store %arg7[%c0_24, %c0_25, %c0_26], %46 {strides = array<i32>} : memref<1x128x1xf32, #tpu.memory_space<vmem>>, vector<1x128x1xf32>,
    } else {
    }
    return
  }
  func.func @transform_0(%arg0: i32, %arg1: i32) -> (i32, i32, i32) {
    %c0_i32 = arith.constant 0 : i32
    %c0_i32_0 = arith.constant 0 : i32
    return %arg0, %c0_i32, %arg1 : i32, i32, i32
  }
  func.func @transform_1(%arg0: i32, %arg1: i32) -> (i32, i32) {
    %c0_i32 = arith.constant 0 : i32
    %c0_i32_0 = arith.constant 0 : i32
    %c0_i32_1 = arith.constant 0 : i32
    return %c0_i32, %c0_i32_0 : i32, i32
  }
  func.func @transform_2(%arg0: i32, %arg1: i32) -> (i32, i32) {
    %c0_i32 = arith.constant 0 : i32
    %c0_i32_0 = arith.constant 0 : i32
    %c0_i32_1 = arith.constant 0 : i32
    return %c0_i32, %c0_i32_0 : i32, i32
  }
  func.func @transform_3(%arg0: i32, %arg1: i32) -> (i32, i32) {
    %c0_i32 = arith.constant 0 : i32
    %c0_i32_0 = arith.constant 0 : i32
    %c0_i32_1 = arith.constant 0 : i32
    return %c0_i32, %c0_i32_0 : i32, i32
  }
  func.func @transform_4(%arg0: i32, %arg1: i32) -> (i32, i32) {
    %c0_i32 = arith.constant 0 : i32
    %c0_i32_0 = arith.constant 0 : i32
    %c0_i32_1 = arith.constant 0 : i32
    return %c0_i32, %c0_i32_0 : i32, i32
  }
  func.func @transform_5(%arg0: i32, %arg1: i32) -> (i32, i32, i32) {
    %c0_i32 = arith.constant 0 : i32
    %c0_i32_0 = arith.constant 0 : i32
    %c0_i32_1 = arith.constant 0 : i32
    return %arg0, %c0_i32, %c0_i32_0 : i32, i32, i32
  }
}

</mosaic_0001>

<bundles_post_ra>
// kernel: tpu_custom_call.1
= control target key start
LH: loop header
LB: loop body
LE: loop exit
PB: predicated region body
PF: predicated region fallthrough
CT: control target
= control target key end

     0   :  { %s2804_s18 = smov 0   ;;  %s2806_s19 = smov 0   ;;  %s4090_s0 = inlined_call_operand.vmem [shape: bf16[2,32,1024], index: 0, kind: input, shape index: {}]   ;;  %s4091_s1 = inlined_call_operand.vmem [shape: bf16[256,32], index: 1, kind: input, shape index: {}]   ;;  %s4092_s2 = inlined_call_operand.vmem [shape: f32[256,1], index: 2, kind: input, shape index: {}]   ;;  %s4093_s3 = inlined_call_operand.vmem [shape: f32[128,256], index: 3, kind: input, shape index: {}]   ;;  %s4094_s4 = inlined_call_operand.vmem [shape: f32[128,1], index: 4, kind: input, shape index: {}]   ;;  %s4095_s5 = inlined_call_operand.vmem [shape: f32[2,128,1], index: 5, kind: output, shape index: {}]  }
   0x1   :  { %s2808_s20 = smov 0  }
   0x2 LB: > { %s27_s21 = sadd.s32 1, %s2767_s19  ;;  %p2485_p0 = scmp.ge.s32.totalorder %s2771_s20, 1  ;;  %s2771_s20 = sphi %s2808_s20, %s15_s20   ;;  %s2767_s19 = sphi %s2806_s19, %s4235_s19   ;;  %s2763_s18 = sphi %s2804_s18, %s4234_s18  }
   0x3   : > { %p29_p1 = scmp.ge.s32.totalorder %s27_s21, 2  ;;  %p206_p2 = scmp.lt.s32.totalorder %s2771_s20, 3 }
   0x5   : > { %s4237_s21 = smov (%p29_p1, %s27_s21), 0  ;;  %p207_p3 = pnand %p2485_p0, %p206_p2 }
   0x7   : > { %210 = sbr.rel (%p207_p3) target bundleno = 963 (0x3c3), region = 40 }
   0xe   : > { %p239_p4 = scmp.lt.s32.totalorder %s2763_s18, 1  ;;  %v4096_v0 = vmov 0   ;;  %v2845_v11 = vld [vmem:[%s4091_s1] sm:$0xff]   ;;  %vm690_vm0 = vcmask 261120   ;;  %v355_v20 = vld [vmem:[%s4092_s2 + $0x88] sm:$0xff]  ;;  %v356_v23 = vld [vmem:[%s4092_s2 + $0x90] sm:$0xff] }
   0xf   : > { %771 = vmatprep.mubr.bf16.mxu0 %v4096_v0  ;;  %891 = vmatprep.mubr.bf16.mxu1 %v4096_v0  ;;  %v2850_v12 = vld [vmem:[%s4091_s1 + $0x60] sm:$0xff]   ;;  %v339_v21 = vld [vmem:[%s4092_s2 + $0x8] sm:$0xff]  ;;  %v357_v26 = vld [vmem:[%s4092_s2 + $0x98] sm:$0xff]  ;;  %vm2395_vm1 = vcmask 7168  }
  0x10   : > { %s4239_s18 = smov (!%p239_p4, %s2763_s18), 1  ;;  %2731 = vset.pattern.permute.xlu0 %v4096_v0  ;;  %2732 = vset.pattern.permute.xlu1 %v4096_v0  ;;  %v354_v16 = vld [vmem:[%s4092_s2 + $0x80] sm:$0xff]  ;;  %v2878_v24 = vld [vmem:[%s4091_s1 + $0x8] sm:$0xff]   ;;  %v340_v27 = vld [vmem:[%s4092_s2 + $0x10] sm:$0xff] }
  0x11   : > { %s2588_s22 = sshll.u32 %s4239_s18, 7  ;;  %v338_v17 = vld [vmem:[%s4092_s2] sm:$0xff]  ;;  %452 = vperm.xlu0 %2731, %v354_v16   ;;  %v2883_v25 = vld [vmem:[%s4091_s1 + $0x68] sm:$0xff]   ;;  %v341_v28 = vld [vmem:[%s4092_s2 + $0x18] sm:$0xff] }
  0x12   : > { %s2834_s25 = scalar_lea.vmem %s4090_s0, %s2588_s22  ;;  %372 = vperm.xlu1 %2732, %v338_v17   ;;  %v2907_v35 = vld [vmem:[%s4091_s1 + $0x10] sm:$0xff]   ;;  %v358_v36 = vld [vmem:[%s4092_s2 + $0xa0] sm:$0xff]  ;;  %v359_v40 = vld [vmem:[%s4092_s2 + $0xa8] sm:$0xff]  ;;  %s4002_s7 = scalar_lea.vmem %s4095_s5, %s2588_s22 }
  0x13   : > { %v322_v1 = vld [vmem:[%s2834_s25] sm:$0xff]  ;;  %v323_v8 = vld [vmem:[%s2834_s25 + $0x8] sm:$0xff]  ;;  %v324_v29 = vld [vmem:[%s2834_s25 + $0x10] sm:$0xff] }
  0x14   : > { %v326_v2 = vld [vmem:[%s2834_s25 + $0x20] sm:$0xff]  ;;  %v327_v10 = vld [vmem:[%s2834_s25 + $0x28] sm:$0xff]  ;;  %v328_v30 = vld [vmem:[%s2834_s25 + $0x30] sm:$0xff] }
  0x15   : > { %v330_v3 = vld [vmem:[%s2834_s25 + $0x40] sm:$0xff]  ;;  %v2507_v4 = vcombine.high %v322_v1, %v326_v2  ;;  %v2506_v5 = vcombine.low %v322_v1, %v326_v2  ;;  %v2509_v13 = vcombine.high %v323_v8, %v327_v10  ;;  %v331_v14 = vld [vmem:[%s2834_s25 + $0x48] sm:$0xff]  ;;  %v2508_v18 = vcombine.low %v323_v8, %v327_v10  ;;  %457 = vperm.xlu0 %2731, %v355_v20   ;;  %v332_v33 = vld [vmem:[%s2834_s25 + $0x50] sm:$0xff] }
  0x16   : > { %v334_v6 = vld [vmem:[%s2834_s25 + $0x60] sm:$0xff]  ;;  %v335_v15 = vld [vmem:[%s2834_s25 + $0x68] sm:$0xff]  ;;  %377 = vperm.xlu1 %2732, %v339_v21   ;;  %v2510_v31 = vcombine.low %v324_v29, %v328_v30  ;;  %v2511_v32 = vcombine.high %v324_v29, %v328_v30  ;;  %v336_v34 = vld [vmem:[%s2834_s25 + $0x70] sm:$0xff] }
  0x17   : > { %v2515_v7 = vcombine.high %v330_v3, %v334_v6  ;;  %739 = vmatprep.subr.bf16.mxu0 %v2507_v4  ;;  %2702 = vmatprep.subr.bf16.mxu1 %v2507_v4  ;;  %v2514_v9 = vcombine.low %v330_v3, %v334_v6  ;;  %v2517_v19 = vcombine.high %v331_v14, %v335_v15  ;;  %v325_v38 = vld [vmem:[%s2834_s25 + $0x18] sm:$0xff]  ;;  %v2916_v39 = vld [vmem:[%s4091_s1 + $0x70] sm:$0xff]   ;;  %v342_v44 = vld [vmem:[%s4092_s2 + $0x20] sm:$0xff] }
  0x18   : > { %740 = vmatpush1.bf16.msra.mxu0 %v2506_v5  ;;  %2704 = vmatpush1.bf16.msra.mxu1 %v2506_v5  ;;  %v2516_v22 = vcombine.low %v331_v14, %v335_v15  ;;  %v2519_v37 = vcombine.high %v332_v33, %v336_v34  ;;  %v329_v41 = vld [vmem:[%s2834_s25 + $0x38] sm:$0xff]  ;;  %v2518_v43 = vcombine.low %v332_v33, %v336_v34  ;;  %v343_v45 = vld [vmem:[%s4092_s2 + $0x28] sm:$0xff]  ;;  %v360_v46 = vld [vmem:[%s4092_s2 + $0xb0] sm:$0xff] }
  0x19   : > { %741 = vmatprep.subr.bf16.mxu0 %v2515_v7  ;;  %2703 = vmatprep.subr.bf16.mxu1 %v2515_v7  ;;  %v2513_v42 = vcombine.high %v325_v38, %v329_v41  ;;  %v2940_v47 = vld [vmem:[%s4091_s1 + $0x18] sm:$0xff]   ;;  %v344_v50 = vld [vmem:[%s4092_s2 + $0x30] sm:$0xff]  ;;  %v2965_v52 = vld [vmem:[%s4091_s1 + $0x20] sm:$0xff]   ;;  %v2512_v57 = vcombine.low %v325_v38, %v329_v41 }
  0x1a   : > { %462 = vperm.xlu0 %2731, %v356_v23   ;;  %467 = vperm.xlu1 %2732, %v357_v26   ;;  %v2945_v48 = vld [vmem:[%s4091_s1 + $0x78] sm:$0xff]   ;;  %v362_v53 = vld [vmem:[%s4092_s2 + $0xc0] sm:$0xff]  ;;  %v363_v54 = vld [vmem:[%s4092_s2 + $0xc8] sm:$0xff] }
  0x1b   : > { %v361_v49 = vld [vmem:[%s4092_s2 + $0xb8] sm:$0xff]  ;;  %v346_v58 = vld [vmem:[%s4092_s2 + $0x40] sm:$0xff]  ;;  %v347_v60 = vld [vmem:[%s4092_s2 + $0x48] sm:$0xff] }
  0x1c   : > { %742 = vmatpush1.bf16.msra.mxu0 %v2514_v9  ;;  %2705 = vmatpush1.bf16.msra.mxu1 %v2514_v9  ;;  %v345_v51 = vld [vmem:[%s4092_s2 + $0x38] sm:$0xff]  ;;  %v364_v62 = vld [vmem:[%s4092_s2 + $0xd0] sm:$0xff]  ;;  %v2993_v63 = vld [vmem:[%s4091_s1 + $0x28] sm:$0xff]  }
  0x1d   : > { %932 = vmatprep.subr.bf16.mxu1 %v2509_v13  ;;  %1125 = vmatprep.subr.bf16.mxu0 %v2511_v32  ;;  %v333_v55 = vld [vmem:[%s2834_s25 + $0x58] sm:$0xff]  ;;  %v348_v2 = vld [vmem:[%s4092_s2 + $0x50] sm:$0xff]  ;;  %v366_v4 = vld [vmem:[%s4092_s2 + $0xe0] sm:$0xff] }
  0x1e   : > { %382 = vperm.xlu0 %2731, %v340_v27   ;;  %387 = vperm.xlu1 %2732, %v341_v28   ;;  %v337_v56 = vld [vmem:[%s2834_s25 + $0x78] sm:$0xff]  ;;  %v3016_v5 = vld [vmem:[%s4091_s1 + $0x30] sm:$0xff]   ;;  %v367_v6 = vld [vmem:[%s4092_s2 + $0xe8] sm:$0xff] }
  0x1f   : > { %2522 = vmatmul.mubr.msk.bf16.vlgmr.msra.gmra.mrb[0].mxu0 %vm690_vm0, %v2845_v11  ;;  %2534 = vmatmul.mubr.msk.bf16.vlgmr.msra.gmra.mrb[0].mxu1 %vm690_vm0, %v2850_v12  ;;  %v2521_v59 = vcombine.high %v333_v55, %v337_v56  ;;  %v2520_v61 = vcombine.low %v333_v55, %v337_v56  ;;  %v365_v1 = vld [vmem:[%s4092_s2 + $0xd8] sm:$0xff]  ;;  %v350_v7 = vld [vmem:[%s4092_s2 + $0x60] sm:$0xff]  ;;  %v351_v8 = vld [vmem:[%s4092_s2 + $0x68] sm:$0xff] }
  0x20   : > { %781 = vmatprep.mubr.bf16.mxu0 %v4096_v0  ;;  %901 = vmatprep.mubr.bf16.mxu1 %v4096_v0  ;;  %v349_v3 = vld [vmem:[%s4092_s2 + $0x58] sm:$0xff]  ;;  %v368_v9 = vld [vmem:[%s4092_s2 + $0xf0] sm:$0xff]  ;;  %v3059_v16 = vld [vmem:[%s4091_s1 + $0x40] sm:$0xff]  }
  0x21   : > { %933 = vmatpush1.bf16.msra.mxu1 %v2508_v18  ;;  %1126 = vmatpush1.bf16.msra.mxu0 %v2510_v31  ;;  %v3039_v10 = vld [vmem:[%s4091_s1 + $0x38] sm:$0xff]   ;;  %v352_v14 = vld [vmem:[%s4092_s2 + $0x70] sm:$0xff]  ;;  %v3070_v17 = vld [vmem:[%s4091_s1 + $0x48] sm:$0xff]  }
  0x22   : > { %934 = vmatprep.subr.bf16.mxu1 %v2517_v19  ;;  %1127 = vmatprep.subr.bf16.mxu0 %v2519_v37  ;;  %v369_v13 = vld [vmem:[%s4092_s2 + $0xf8] sm:$0xff]  ;;  %v3081_v18 = vld [vmem:[%s4091_s1 + $0x50] sm:$0xff]  }
  0x23   : > { %472 = vperm.xlu0 %2731, %v358_v36   ;;  %477 = vperm.xlu1 %2732, %v359_v40   ;;  %v353_v15 = vld [vmem:[%s4092_s2 + $0x78] sm:$0xff] }
  0x24   : > { %v3092_v19 = vld [vmem:[%s4091_s1 + $0x58] sm:$0xff]  }
  0x25   : > { %935 = vmatpush1.bf16.msra.mxu1 %v2516_v22  ;;  %1128 = vmatpush1.bf16.msra.mxu0 %v2518_v43 }
  0x26   : > { %1318 = vmatprep.subr.bf16.mxu1 %v2513_v42 }
  0x27   : > { %2523 = vmatmul.mubr.msk.bf16.gmra.mrb[4].mxu0 %vm690_vm0, %v2878_v24  ;;  %2535 = vmatmul.mubr.msk.bf16.gmra.mrb[4].mxu1 %vm690_vm0, %v2883_v25 }
  0x28   : > { %791 = vmatprep.mubr.bf16.mxu0 %v4096_v0  ;;  %911 = vmatprep.mubr.bf16.mxu1 %v4096_v0 }
  0x29   : > { %392 = vperm.xlu0 %2731, %v342_v44   ;;  %397 = vperm.xlu1 %2732, %v343_v45  }
  0x2d   : > { %482 = vperm.xlu0 %2731, %v360_v46   ;;  %487 = vperm.xlu1 %2732, %v361_v49  }
  0x2f   : > { %2524 = vmatmul.mubr.msk.bf16.gmra.mrb[8].mxu0 %vm690_vm0, %v2907_v35  ;;  %2536 = vmatmul.mubr.msk.bf16.gmra.mrb[8].mxu1 %vm690_vm0, %v2916_v39 }
  0x30   : > { %801 = vmatprep.mubr.bf16.mxu0 %v4096_v0  ;;  %921 = vmatprep.mubr.bf16.mxu1 %v4096_v0 }
  0x31   : > { %402 = vperm.xlu0 %2731, %v344_v50   ;;  %407 = vperm.xlu1 %2732, %v345_v51  }
  0x35   : > { %492 = vperm.xlu0 %2731, %v362_v53   ;;  %497 = vperm.xlu1 %2732, %v363_v54  }
  0x37   : > { %2525 = vmatmul.mubr.msk.bf16.gmra.mrb[12].mxu0 %vm690_vm0, %v2940_v47  ;;  %2537 = vmatmul.mubr.msk.bf16.gmra.mrb[12].mxu1 %vm690_vm0, %v2945_v48 }
  0x38   : > { %811 = vmatprep.mubr.bf16.mxu0 %v4096_v0  ;;  %964 = vmatprep.mubr.bf16.mxu1 %v4096_v0 }
  0x39   : > { %412 = vperm.xlu0 %2731, %v346_v58   ;;  %417 = vperm.xlu1 %2732, %v347_v60  }
  0x3d   : > { %502 = vperm.xlu0 %2731, %v364_v62   ;;  %507 = vperm.xlu1 %2732, %v365_v1  }
  0x3f   : > { %2526 = vmatmul.mubr.msk.bf16.gmra.mrb[16].mxu0 %vm690_vm0, %v2965_v52  ;;  %2538 = vmatmul.mubr.msk.bf16.vlgmr.msra.gmra.mrb[16].mxu1 %vm690_vm0, %v2845_v11 }
  0x40   : > { %821 = vmatprep.mubr.bf16.mxu0 %v4096_v0  ;;  %974 = vmatprep.mubr.bf16.mxu1 %v4096_v0 }
  0x41   : > { %1319 = vmatpush1.bf16.msra.mxu1 %v2512_v57  ;;  %422 = vperm.xlu0 %2731, %v348_v2  }
  0x42   : > { %1320 = vmatprep.subr.bf16.mxu1 %v2521_v59  ;;  %427 = vperm.xlu1 %2732, %v349_v3  }
  0x45   : > { %1321 = vmatpush1.bf16.msra.mxu1 %v2520_v61  ;;  %512 = vperm.xlu0 %2731, %v366_v4  }
  0x46   : > { %517 = vperm.xlu1 %2732, %v367_v6  }
  0x47   : > { %2527 = vmatmul.mubr.msk.bf16.gmra.mrb[20].mxu0 %vm690_vm0, %v2993_v63  ;;  %2539 = vmatmul.mubr.msk.bf16.gmra.mrb[20].mxu1 %vm690_vm0, %v2878_v24 }
  0x48   : > { %831 = vmatprep.mubr.bf16.mxu0 %v4096_v0  ;;  %984 = vmatprep.mubr.bf16.mxu1 %v4096_v0 }
  0x49   : > { %432 = vperm.xlu0 %2731, %v350_v7  }
  0x4a   : > { %437 = vperm.xlu1 %2732, %v351_v8  }
  0x4d   : > { %522 = vperm.xlu0 %2731, %v368_v9  }
  0x4e   : > { %527 = vperm.xlu1 %2732, %v369_v13  }
  0x4f   : > { %2528 = vmatmul.mubr.msk.bf16.gmra.mrb[24].mxu0 %vm690_vm0, %v3016_v5  ;;  %2540 = vmatmul.mubr.msk.bf16.gmra.mrb[24].mxu1 %vm690_vm0, %v2907_v35 }
  0x50   : > { %841 = vmatprep.mubr.bf16.mxu0 %v4096_v0  ;;  %994 = vmatprep.mubr.bf16.mxu1 %v4096_v0 }
  0x51   : > { %442 = vperm.xlu0 %2731, %v352_v14  }
  0x52   : > { %447 = vperm.xlu1 %2732, %v353_v15  }
  0x57   : > { %2529 = vmatmul.mubr.msk.bf16.gmra.mrb[28].mxu0 %vm690_vm0, %v3039_v10  ;;  %2541 = vmatmul.mubr.msk.bf16.gmra.mrb[28].mxu1 %vm690_vm0, %v2940_v47 }
  0x58   : > { %851 = vmatprep.mubr.bf16.mxu0 %v4096_v0  ;;  %1004 = vmatprep.mubr.bf16.mxu1 %v4096_v0 }
  0x5f   : > { %2530 = vmatmul.mubr.msk.bf16.gmra.mrb[32].mxu0 %vm690_vm0, %v3059_v16  ;;  %2542 = vmatmul.mubr.msk.bf16.gmra.mrb[32].mxu1 %vm690_vm0, %v2965_v52 }
  0x60   : > { %861 = vmatprep.mubr.bf16.mxu0 %v4096_v0  ;;  %1014 = vmatprep.mubr.bf16.mxu1 %v4096_v0 }
  0x67   : > { %2531 = vmatmul.mubr.msk.bf16.gmra.mrb[36].mxu0 %vm690_vm0, %v3070_v17  ;;  %2543 = vmatmul.mubr.msk.bf16.gmra.mrb[36].mxu1 %vm690_vm0, %v2993_v63 }
  0x68   : > { %871 = vmatprep.mubr.bf16.mxu0 %v4096_v0  ;;  %1024 = vmatprep.mubr.bf16.mxu1 %v4096_v0 }
  0x6f   : > { %2532 = vmatmul.mubr.msk.bf16.gmra.mrb[40].mxu0 %vm690_vm0, %v3081_v18  ;;  %2544 = vmatmul.mubr.msk.bf16.gmra.mrb[40].mxu1 %vm690_vm0, %v3016_v5 }
  0x70   : > { %881 = vmatprep.mubr.bf16.mxu0 %v4096_v0  ;;  %1034 = vmatprep.mubr.bf16.mxu1 %v4096_v0 }
  0x77   : > { %2533 = vmatmul.mubr.msk.bf16.gmra.mrb[44].mxu0 %vm690_vm0, %v3092_v19  ;;  %2545 = vmatmul.mubr.msk.bf16.gmra.mrb[44].mxu1 %vm690_vm0, %v3039_v10 }
  0x78   : > { %1044 = vmatprep.mubr.bf16.mxu1 %v4096_v0  ;;  %1157 = vmatprep.mubr.bf16.mxu0 %v4096_v0 }
  0x7f   : > { %2546 = vmatmul.mubr.msk.bf16.gmra.mrb[48].mxu1 %vm690_vm0, %v3059_v16  ;;  %2554 = vmatmul.mubr.msk.bf16.vlgmr.msra.gmra.mrb[48].mxu0 %vm690_vm0, %v2845_v11 }
  0x80   : > { %1054 = vmatprep.mubr.bf16.mxu1 %v4096_v0  ;;  %1167 = vmatprep.mubr.bf16.mxu0 %v4096_v0 }
  0x87   : > { %2547 = vmatmul.mubr.msk.bf16.gmra.mrb[52].mxu1 %vm690_vm0, %v3070_v17  ;;  %2555 = vmatmul.mubr.msk.bf16.gmra.mrb[52].mxu0 %vm690_vm0, %v2878_v24 }
  0x88   : > { %1064 = vmatprep.mubr.bf16.mxu1 %v4096_v0  ;;  %1177 = vmatprep.mubr.bf16.mxu0 %v4096_v0 }
  0x8f   : > { %2548 = vmatmul.mubr.msk.bf16.gmra.mrb[56].mxu1 %vm690_vm0, %v3081_v18  ;;  %2556 = vmatmul.mubr.msk.bf16.gmra.mrb[56].mxu0 %vm690_vm0, %v2907_v35 }
  0x90   : > { %1074 = vmatprep.mubr.bf16.mxu1 %v4096_v0  ;;  %1187 = vmatprep.mubr.bf16.mxu0 %v4096_v0  ;;  %v3140_v20 = vpop.permute.xlu0 %452 }
  0x91   : > { %v3142_v21 = vpop.permute.xlu1 %372 }
  0x92   : > { %4140 = vst [vmem:[#allocation3_spill] sm:$0xff] %v3142_v21 }
  0x94   : > { %v3146_v22 = vpop.permute.xlu0 %457 }
  0x95   : > { %4141 = vst [vmem:[#allocation4_spill] sm:$0xff] %v3146_v22  ;;  %v3148_v23 = vpop.permute.xlu1 %377 }
  0x97   : > { %2549 = vmatmul.mubr.msk.bf16.gmra.mrb[60].mxu1 %vm690_vm0, %v3092_v19  ;;  %2557 = vmatmul.mubr.msk.bf16.gmra.mrb[60].mxu0 %vm690_vm0, %v2940_v47 }
  0x98   : > { %1084 = vmatprep.mubr.bf16.mxu1 %v4096_v0  ;;  %1197 = vmatprep.mubr.bf16.mxu0 %v4096_v0 }
  0x99   : > { %v3156_v26 = vpop.permute.xlu0 %462  ;;  %v3158_v27 = vpop.permute.xlu1 %467 }
  0x9d   : > { %v3166_v28 = vpop.permute.xlu0 %382  ;;  %v3168_v29 = vpop.permute.xlu1 %387 }
  0x9f   : > { %2550 = vmatmul.mubr.msk.bf16.gmra.mrb[64].mxu1 %vm690_vm0, %v2850_v12  ;;  %2558 = vmatmul.mubr.msk.bf16.gmra.mrb[64].mxu0 %vm690_vm0, %v2965_v52 }
  0xa0   : > { %1094 = vmatprep.mubr.bf16.mxu1 %v4096_v0  ;;  %1207 = vmatprep.mubr.bf16.mxu0 %v4096_v0 }
  0xa2   : > { %v3174_v30 = vpop.permute.xlu0 %472  ;;  %v3176_v31 = vpop.permute.xlu1 %477 }
  0xa7   : > { %2551 = vmatmul.mubr.msk.bf16.gmra.mrb[68].mxu1 %vm690_vm0, %v2883_v25  ;;  %2559 = vmatmul.mubr.msk.bf16.gmra.mrb[68].mxu0 %vm690_vm0, %v2993_v63 }
  0xa8   : > { %1104 = vmatprep.mubr.bf16.mxu1 %v4096_v0  ;;  %1217 = vmatprep.mubr.bf16.mxu0 %v4096_v0  ;;  %v3182_v32 = vpop.permute.xlu1 %397 }
  0xac   : > { %v3192_v33 = vpop.permute.xlu1 %487 }
  0xaf   : > { %2552 = vmatmul.mubr.msk.bf16.gmra.mrb[72].mxu1 %vm690_vm0, %v2916_v39  ;;  %2560 = vmatmul.mubr.msk.bf16.gmra.mrb[72].mxu0 %vm690_vm0, %v3016_v5 }
  0xb0   : > { %1114 = vmatprep.mubr.bf16.mxu1 %v4096_v0  ;;  %1227 = vmatprep.mubr.bf16.mxu0 %v4096_v0 }
  0xb7   : > { %2553 = vmatmul.mubr.msk.bf16.gmra.mrb[76].mxu1 %vm690_vm0, %v2945_v48  ;;  %2561 = vmatmul.mubr.msk.bf16.gmra.mrb[76].mxu0 %vm690_vm0, %v3039_v10 }
  0xb8   : > { %1237 = vmatprep.mubr.bf16.mxu0 %v4096_v0  ;;  %1350 = vmatprep.mubr.bf16.mxu1 %v4096_v0 }
  0xbf   : > { %2562 = vmatmul.mubr.msk.bf16.gmra.mrb[80].mxu0 %vm690_vm0, %v3059_v16  ;;  %2570 = vmatmul.mubr.msk.bf16.vlgmr.msra.gmra.mrb[80].mxu1 %vm690_vm0, %v2845_v11  ;;  %v3180_v11 = vpop.permute.xlu0 %392 }
  0xc0   : > { %1247 = vmatprep.mubr.bf16.mxu0 %v4096_v0  ;;  %1360 = vmatprep.mubr.bf16.mxu1 %v4096_v0 }
  0xc7   : > { %2563 = vmatmul.mubr.msk.bf16.gmra.mrb[84].mxu0 %vm690_vm0, %v3070_v17  ;;  %2571 = vmatmul.mubr.msk.bf16.gmra.mrb[84].mxu1 %vm690_vm0, %v2878_v24  ;;  %v3190_v24 = vpop.permute.xlu0 %482 }
  0xc8   : > { %1257 = vmatprep.mubr.bf16.mxu0 %v4096_v0  ;;  %1370 = vmatprep.mubr.bf16.mxu1 %v4096_v0 }
  0xcb   : > { %v3200_v34 = vpop.permute.xlu0 %402 }
  0xcf   : > { %2564 = vmatmul.mubr.msk.bf16.gmra.mrb[88].mxu0 %vm690_vm0, %v3081_v18  ;;  %2572 = vmatmul.mubr.msk.bf16.gmra.mrb[88].mxu1 %vm690_vm0, %v2907_v35  ;;  %v3202_v35 = vpop.permute.xlu1 %407  ;;  %v3208_v36 = vpop.permute.xlu0 %492 }
  0xd0   : > { %1267 = vmatprep.mubr.bf16.mxu0 %v4096_v0  ;;  %1380 = vmatprep.mubr.bf16.mxu1 %v4096_v0  ;;  %4142 = vst [vmem:[#allocation5_spill] sm:$0xff] %v3208_v36 }
  0xd3   : > { %v3210_v37 = vpop.permute.xlu1 %497  ;;  %v3214_v38 = vpop.permute.xlu0 %412 }
  0xd4   : > { %4143 = vst [vmem:[#allocation6_spill] sm:$0xff] %v3210_v37  ;;  %4144 = vst [vmem:[#allocation7_spill] sm:$0xff] %v3214_v38 }
  0xd7   : > { %2565 = vmatmul.mubr.msk.bf16.gmra.mrb[92].mxu0 %vm690_vm0, %v3092_v19  ;;  %2573 = vmatmul.mubr.msk.bf16.gmra.mrb[92].mxu1 %vm690_vm0, %v2940_v47  ;;  %v3216_v40 = vpop.permute.xlu1 %417  ;;  %v3224_v41 = vpop.permute.xlu0 %502 }
  0xd8   : > { %1277 = vmatprep.mubr.bf16.mxu0 %v4096_v0  ;;  %1390 = vmatprep.mubr.bf16.mxu1 %v4096_v0  ;;  %4145 = vst [vmem:[#allocation8_spill] sm:$0xff] %v3224_v41 }
  0xdb   : > { %v3226_v42 = vpop.permute.xlu1 %507  ;;  %v3234_v43 = vpop.permute.xlu0 %422 }
  0xdc   : > { %4146 = vst [vmem:[#allocation9_spill] sm:$0xff] %v3226_v42  ;;  %4147 = vst [vmem:[#allocation10_spill] sm:$0xff] %v3234_v43 }
  0xdf   : > { %2566 = vmatmul.mubr.msk.bf16.gmra.mrb[96].mxu0 %vm690_vm0, %v2850_v12  ;;  %2574 = vmatmul.mubr.msk.bf16.gmra.mrb[96].mxu1 %vm690_vm0, %v2965_v52  ;;  %v3236_v44 = vpop.permute.xlu1 %427  ;;  %v3255_v9 = vpop.permute.xlu0 %512 }
  0xe0   : > { %1287 = vmatprep.mubr.bf16.mxu0 %v4096_v0  ;;  %1400 = vmatprep.mubr.bf16.mxu1 %v4096_v0  ;;  %4148 = vst [vmem:[#allocation11_spill] sm:$0xff] %v3255_v9 }
  0xe3   : > { %v3257_v13 = vpop.permute.xlu1 %517 }
  0xe4   : > { %4149 = vst [vmem:[#allocation12_spill] sm:$0xff] %v3257_v13 }
  0xe7   : > { %2567 = vmatmul.mubr.msk.bf16.gmra.mrb[100].mxu0 %vm690_vm0, %v2883_v25  ;;  %2575 = vmatmul.mubr.msk.bf16.gmra.mrb[100].mxu1 %vm690_vm0, %v2993_v63 }
  0xe8   : > { %1297 = vmatprep.mubr.bf16.mxu0 %v4096_v0  ;;  %1410 = vmatprep.mubr.bf16.mxu1 %v4096_v0 }
  0xef   : > { %2568 = vmatmul.mubr.msk.bf16.gmra.mrb[104].mxu0 %vm690_vm0, %v2916_v39  ;;  %2576 = vmatmul.mubr.msk.bf16.gmra.mrb[104].mxu1 %vm690_vm0, %v3016_v5 }
  0xf0   : > { %1307 = vmatprep.mubr.bf16.mxu0 %v4096_v0  ;;  %1420 = vmatprep.mubr.bf16.mxu1 %v4096_v0 }
  0xf2   : > { %v893_v45 = vpop.f32.mrb[0].mxu1  ;;  %v773_v46 = vpop.f32.mrb[0].mxu0 }
  0xf3   : > { %v894_v47 = vadd.f32 %v893_v45, %v3208_v36  ;;  %v895_v49 = vpop.f32.mrb[1].mxu1  ;;  %v774_v50 = vadd.f32 %v773_v46, %v3142_v21  ;;  %v775_v51 = vpop.f32.mrb[1].mxu0 }
  0xf4   : > { %v896_v52 = vadd.f32 %v895_v49, %v3208_v36  ;;  %v897_v53 = vpop.f32.mrb[2].mxu1  ;;  %v776_v54 = vadd.f32 %v775_v51, %v3142_v21  ;;  %v777_v55 = vpop.f32.mrb[2].mxu0 }
  0xf5   : > { %v1703_v56 = vmax.f32 %v894_v47, 0.0  ;;  %v898_v57 = vadd.f32 %v897_v53, %v3210_v37  ;;  %v899_v58 = vpop.f32.mrb[3].mxu1  ;;  %v1511_v59 = vmax.f32 %v774_v50, 0.0  ;;  %v778_v60 = vadd.f32 %v777_v55, %v3148_v23  ;;  %v779_v61 = vpop.f32.mrb[3].mxu0 }
  0xf6   : > { %v1704_v62 = vmax.f32 %v896_v52, 0.0  ;;  %v900_v63 = vadd.f32 %v899_v58, %v3210_v37  ;;  %v1512_v1 = vmax.f32 %v776_v54, 0.0  ;;  %v780_v2 = vadd.f32 %v779_v61, %v3148_v23 }
  0xf7   : > { %v1711_v3 = vmax.f32 %v898_v57, 0.0  ;;  %2569 = vmatmul.mubr.msk.bf16.gmra.mrb[108].mxu0 %vm690_vm0, %v2945_v48  ;;  %2577 = vmatmul.mubr.msk.bf16.gmra.mrb[108].mxu1 %vm690_vm0, %v3039_v10  ;;  %v1519_v4 = vmax.f32 %v778_v60, 0.0 }
  0xf8   : > { %v3250_v5 = vadd.f32 %v1704_v62, %v1703_v56  ;;  %v1712_v6 = vmax.f32 %v900_v63, 0.0  ;;  %1430 = vmatprep.mubr.bf16.mxu1 %v4096_v0  ;;  %v3253_v7 = vadd.f32 %v1512_v1, %v1511_v59  ;;  %v1520_v8 = vmax.f32 %v780_v2, 0.0 }
  0xfa   : > { %v3259_v14 = vadd.f32 %v1712_v6, %v1711_v3  ;;  %v903_v15 = vpop.f32.mrb[4].mxu1  ;;  %v3261_v45 = vadd.f32 %v1520_v8, %v1519_v4  ;;  %v783_v46 = vpop.f32.mrb[4].mxu0 }
  0xfb   : > { %v904_v10 = vadd.f32 %v903_v15, %v3224_v41  ;;  %v905_v47 = vpop.f32.mrb[5].mxu1  ;;  %v784_v49 = vadd.f32 %v783_v46, %v3166_v28  ;;  %v785_v50 = vpop.f32.mrb[5].mxu0 }
  0xfc   : > { %4150 = vst [vmem:[#allocation13_spill] sm:$0xff] %v3259_v14  ;;  %v906_v51 = vadd.f32 %v905_v47, %v3224_v41  ;;  %v907_v52 = vpop.f32.mrb[6].mxu1  ;;  %v786_v53 = vadd.f32 %v785_v50, %v3166_v28  ;;  %v787_v54 = vpop.f32.mrb[6].mxu0 }
  0xfd   : > { %v1719_v55 = vmax.f32 %v904_v10, 0.0  ;;  %v908_v56 = vadd.f32 %v907_v52, %v3226_v42  ;;  %v909_v57 = vpop.f32.mrb[7].mxu1  ;;  %v1527_v58 = vmax.f32 %v784_v49, 0.0  ;;  %v788_v59 = vadd.f32 %v787_v54, %v3168_v29  ;;  %v789_v60 = vpop.f32.mrb[7].mxu0 }
  0xfe   : > { %v1720_v61 = vmax.f32 %v906_v51, 0.0  ;;  %v910_v62 = vadd.f32 %v909_v57, %v3226_v42  ;;  %v1528_v63 = vmax.f32 %v786_v53, 0.0  ;;  %v790_v1 = vadd.f32 %v789_v60, %v3168_v29  ;;  %v3278_v46 = vpop.permute.xlu0 %432  ;;  %v3280_v10 = vpop.permute.xlu1 %437 }
  0xff   : > { %v1727_v2 = vmax.f32 %v908_v56, 0.0  ;;  %2578 = vmatmul.mubr.msk.bf16.gmra.mrb[112].mxu1 %vm690_vm0, %v3059_v16  ;;  %v1535_v3 = vmax.f32 %v788_v59, 0.0  ;;  %4152 = vst [vmem:[#allocation15_spill] sm:$0xff] %v3278_v46 }
 0x100   : > { %v3273_v4 = vadd.f32 %v1720_v61, %v1719_v55  ;;  %v1728_v6 = vmax.f32 %v910_v62, 0.0  ;;  %1440 = vmatprep.mubr.bf16.mxu1 %v4096_v0  ;;  %v3276_v8 = vadd.f32 %v1528_v63, %v1527_v58  ;;  %v1536_v15 = vmax.f32 %v790_v1, 0.0 }
 0x102   : > { %4151 = vst [vmem:[#allocation14_spill] sm:$0xff] %v3273_v4  ;;  %v3282_v47 = vadd.f32 %v1728_v6, %v1727_v2  ;;  %v913_v49 = vpop.f32.mrb[8].mxu1  ;;  %v3284_v50 = vadd.f32 %v1536_v15, %v1535_v3  ;;  %v793_v51 = vpop.f32.mrb[8].mxu0 }
 0x103   : > { %v914_v16 = vadd.f32 %v913_v49, %v3255_v9  ;;  %v915_v52 = vpop.f32.mrb[9].mxu1  ;;  %v794_v53 = vadd.f32 %v793_v51, %v3180_v11  ;;  %v795_v54 = vpop.f32.mrb[9].mxu0 }
 0x104   : > { %4153 = vst [vmem:[#allocation16_spill] sm:$0xff] %v3282_v47  ;;  %v916_v55 = vadd.f32 %v915_v52, %v3255_v9  ;;  %v917_v56 = vpop.f32.mrb[10].mxu1  ;;  %v796_v57 = vadd.f32 %v795_v54, %v3180_v11  ;;  %v797_v58 = vpop.f32.mrb[10].mxu0 }
 0x105   : > { %v1735_v59 = vmax.f32 %v914_v16, 0.0  ;;  %v918_v60 = vadd.f32 %v917_v56, %v3257_v13  ;;  %v919_v61 = vpop.f32.mrb[11].mxu1  ;;  %v1543_v62 = vmax.f32 %v794_v53, 0.0  ;;  %v798_v63 = vadd.f32 %v797_v58, %v3182_v32  ;;  %v799_v1 = vpop.f32.mrb[11].mxu0 }
 0x106   : > { %v1736_v2 = vmax.f32 %v916_v55, 0.0  ;;  %v920_v3 = vadd.f32 %v919_v61, %v3257_v13  ;;  %v1544_v6 = vmax.f32 %v796_v57, 0.0  ;;  %v800_v15 = vadd.f32 %v799_v1, %v3182_v32  ;;  %v3298_v54 = vpop.permute.xlu0 %522  ;;  %v3303_v56 = vpop.permute.xlu1 %527 }
 0x107   : > { %v1743_v49 = vmax.f32 %v918_v60, 0.0  ;;  %2579 = vmatmul.mubr.msk.bf16.gmra.mrb[116].mxu1 %vm690_vm0, %v3070_v17  ;;  %v1551_v51 = vmax.f32 %v798_v63, 0.0  ;;  %4155 = vst [vmem:[#allocation18_spill] sm:$0xff] %v3298_v54  ;;  %4156 = vst [vmem:[#allocation19_spill] sm:$0xff] %v3303_v56 }
 0x108   : > { %v3296_v52 = vadd.f32 %v1736_v2, %v1735_v59  ;;  %v1744_v16 = vmax.f32 %v920_v3, 0.0  ;;  %1450 = vmatprep.mubr.bf16.mxu1 %v4096_v0  ;;  %v3301_v53 = vadd.f32 %v1544_v6, %v1543_v62  ;;  %v1552_v55 = vmax.f32 %v800_v15, 0.0 }
 0x10a   : > { %4154 = vst [vmem:[#allocation17_spill] sm:$0xff] %v3296_v52  ;;  %v3305_v57 = vadd.f32 %v1744_v16, %v1743_v49  ;;  %v923_v58 = vpop.f32.mrb[12].mxu1  ;;  %v3307_v60 = vadd.f32 %v1552_v55, %v1551_v51  ;;  %v803_v61 = vpop.f32.mrb[12].mxu0 }
 0x10b   : > { %v924_v17 = vadd.f32 %v923_v58, %v3298_v54  ;;  %v925_v59 = vpop.f32.mrb[13].mxu1  ;;  %v804_v63 = vadd.f32 %v803_v61, %v3200_v34  ;;  %v805_v1 = vpop.f32.mrb[13].mxu0 }
 0x10c   : > { %4157 = vst [vmem:[#allocation20_spill] sm:$0xff] %v3305_v57  ;;  %v926_v2 = vadd.f32 %v925_v59, %v3298_v54  ;;  %v927_v3 = vpop.f32.mrb[14].mxu1  ;;  %v806_v62 = vadd.f32 %v805_v1, %v3200_v34  ;;  %v807_v6 = vpop.f32.mrb[14].mxu0 }
 0x10d   : > { %v1751_v15 = vmax.f32 %v924_v17, 0.0  ;;  %v928_v49 = vadd.f32 %v927_v3, %v3303_v56  ;;  %v929_v16 = vpop.f32.mrb[15].mxu1  ;;  %v1559_v0 = vmax.f32 %v804_v63, 0.0  ;;  %v808_v51 = vadd.f32 %v807_v6, %v3202_v35  ;;  %v809_v55 = vpop.f32.mrb[15].mxu0 }
 0x10e   : > { %v1752_v57 = vmax.f32 %v926_v2, 0.0  ;;  %v930_v58 = vadd.f32 %v929_v16, %v3303_v56  ;;  %v1560_v52 = vmax.f32 %v806_v62, 0.0  ;;  %v810_v61 = vadd.f32 %v809_v55, %v3202_v35 }
 0x10f   : > { %v1759_v13 = vmax.f32 %v928_v49, 0.0  ;;  %2580 = vmatmul.mubr.msk.bf16.gmra.mrb[120].mxu1 %vm690_vm0, %v3081_v18  ;;  %v1567_v59 = vmax.f32 %v808_v51, 0.0  ;;  %v4159_v3 = vmov 0  }
 0x110   : > { %v3319_v1 = vadd.f32 %v1752_v57, %v1751_v15  ;;  %v1760_v17 = vmax.f32 %v930_v58, 0.0  ;;  %1460 = vmatprep.mubr.bf16.mxu1 %v4159_v3  ;;  %v3322_v63 = vadd.f32 %v1560_v52, %v1559_v0  ;;  %v1568_v6 = vmax.f32 %v810_v61, 0.0 }
 0x112   : > { %4158 = vst [vmem:[#allocation21_spill] sm:$0xff] %v3319_v1  ;;  %v3324_v54 = vadd.f32 %v1760_v17, %v1759_v13  ;;  %v966_v2 = vpop.f32.mrb[16].mxu1  ;;  %v3326_v16 = vadd.f32 %v1568_v6, %v1567_v59  ;;  %v813_v62 = vpop.f32.mrb[16].mxu0 }
 0x113   : > { %v967_v49 = vadd.f32 %v966_v2, %v3142_v21  ;;  %v968_v55 = vpop.f32.mrb[17].mxu1  ;;  %v814_v18 = vadd.f32 %v813_v62, %v3214_v38  ;;  %v815_v51 = vpop.f32.mrb[17].mxu0 }
 0x114   : > { %4160 = vst [vmem:[#allocation22_spill] sm:$0xff] %v3324_v54  ;;  %v969_v57 = vadd.f32 %v968_v55, %v3142_v21  ;;  %v970_v15 = vpop.f32.mrb[18].mxu1  ;;  %v816_v58 = vadd.f32 %v815_v51, %v3214_v38  ;;  %v817_v0 = vpop.f32.mrb[18].mxu0 }
 0x115   : > { %v1513_v52 = vmax.f32 %v967_v49, 0.0  ;;  %v971_v13 = vadd.f32 %v970_v15, %v3148_v23  ;;  %v972_v61 = vpop.f32.mrb[19].mxu1  ;;  %v1575_v17 = vmax.f32 %v814_v18, 0.0  ;;  %v818_v59 = vadd.f32 %v817_v0, %v3216_v40  ;;  %v819_v6 = vpop.f32.mrb[19].mxu0 }
 0x116   : > { %v1514_v54 = vmax.f32 %v969_v57, 0.0  ;;  %v973_v2 = vadd.f32 %v972_v61, %v3148_v23  ;;  %v1576_v1 = vmax.f32 %v816_v58, 0.0  ;;  %v820_v62 = vadd.f32 %v819_v6, %v3216_v40 }
 0x117   : > { %v1799_v55 = vadd.f32 %v3253_v7, %v1513_v52  ;;  %v1521_v56 = vmax.f32 %v971_v13, 0.0  ;;  %2581 = vmatmul.mubr.msk.bf16.gmra.mrb[124].mxu1 %vm690_vm0, %v3092_v19  ;;  %v1583_v49 = vmax.f32 %v818_v59, 0.0 }
 0x118   : > { %v1522_v51 = vmax.f32 %v973_v2, 0.0  ;;  %1470 = vmatprep.mubr.bf16.mxu1 %v4159_v3  ;;  %v3340_v18 = vadd.f32 %v1576_v1, %v1575_v17  ;;  %v1584_v15 = vmax.f32 %v820_v62, 0.0 }
 0x119   : > { %v3342_v0 = vadd.f32 %v1799_v55, %v1514_v54  ;;  %v1800_v57 = vadd.f32 %v3261_v45, %v1521_v56 }
 0x11a   : > { %v976_v58 = vpop.f32.mrb[20].mxu1  ;;  %v3345_v61 = vadd.f32 %v1584_v15, %v1583_v49  ;;  %v823_v6 = vpop.f32.mrb[20].mxu0 }
 0x11b   : > { %v3347_v7 = vadd.f32 %v1800_v57, %v1522_v51  ;;  %v977_v52 = vadd.f32 %v976_v58, %v3166_v28  ;;  %v978_v19 = vpop.f32.mrb[21].mxu1  ;;  %v824_v13 = vadd.f32 %v823_v6, %v3234_v43  ;;  %v825_v59 = vpop.f32.mrb[21].mxu0 }
 0x11c   : > { %v979_v1 = vadd.f32 %v978_v19, %v3166_v28  ;;  %v980_v17 = vpop.f32.mrb[22].mxu1  ;;  %v826_v54 = vadd.f32 %v825_v59, %v3234_v43  ;;  %v827_v2 = vpop.f32.mrb[22].mxu0 }
 0x11d   : > { %v1529_v62 = vmax.f32 %v977_v52, 0.0  ;;  %v981_v45 = vadd.f32 %v980_v17, %v3168_v29  ;;  %v982_v56 = vpop.f32.mrb[23].mxu1  ;;  %v1591_v55 = vmax.f32 %v824_v13, 0.0  ;;  %v828_v49 = vadd.f32 %v827_v2, %v3236_v44  ;;  %v829_v51 = vpop.f32.mrb[23].mxu0 }
 0x11e   : > { %v1530_v15 = vmax.f32 %v979_v1, 0.0  ;;  %v983_v57 = vadd.f32 %v982_v56, %v3168_v29  ;;  %v1592_v58 = vmax.f32 %v826_v54, 0.0  ;;  %v830_v6 = vadd.f32 %v829_v51, %v3236_v44 }
 0x11f   : > { %v1801_v19 = vadd.f32 %v3276_v8, %v1529_v62  ;;  %v1537_v9 = vmax.f32 %v981_v45, 0.0  ;;  %2582 = vmatmul.mubr.msk.bf16.gmra.mrb[128].mxu1 %vm690_vm0, %v2850_v12  ;;  %v1599_v52 = vmax.f32 %v828_v49, 0.0 }
 0x120   : > { %v1538_v59 = vmax.f32 %v983_v57, 0.0  ;;  %1480 = vmatprep.mubr.bf16.mxu1 %v4159_v3  ;;  %v3361_v13 = vadd.f32 %v1592_v58, %v1591_v55  ;;  %v1600_v17 = vmax.f32 %v830_v6, 0.0 }
 0x121   : > { %v3363_v2 = vadd.f32 %v1801_v19, %v1530_v15  ;;  %v1802_v1 = vadd.f32 %v3284_v50, %v1537_v9 }
 0x122   : > { %v986_v54 = vpop.f32.mrb[24].mxu1  ;;  %v3366_v56 = vadd.f32 %v1600_v17, %v1599_v52  ;;  %v833_v51 = vpop.f32.mrb[24].mxu0 }
 0x123   : > { %v3368_v8 = vadd.f32 %v1802_v1, %v1538_v59  ;;  %v987_v62 = vadd.f32 %v986_v54, %v3180_v11  ;;  %v988_v12 = vpop.f32.mrb[25].mxu1  ;;  %v834_v45 = vadd.f32 %v833_v51, %v3278_v46  ;;  %v835_v49 = vpop.f32.mrb[25].mxu0 }
 0x124   : > { %v989_v55 = vadd.f32 %v988_v12, %v3180_v11  ;;  %v990_v57 = vpop.f32.mrb[26].mxu1  ;;  %v836_v15 = vadd.f32 %v835_v49, %v3278_v46  ;;  %v837_v58 = vpop.f32.mrb[26].mxu0 }
 0x125   : > { %v1545_v6 = vmax.f32 %v987_v62, 0.0  ;;  %v991_v9 = vadd.f32 %v990_v57, %v3182_v32  ;;  %v992_v50 = vpop.f32.mrb[27].mxu1  ;;  %v1607_v19 = vmax.f32 %v834_v45, 0.0  ;;  %v838_v52 = vadd.f32 %v837_v58, %v3280_v10  ;;  %v839_v59 = vpop.f32.mrb[27].mxu0 }
 0x126   : > { %v1546_v17 = vmax.f32 %v989_v55, 0.0  ;;  %v993_v1 = vadd.f32 %v992_v50, %v3182_v32  ;;  %v1608_v54 = vmax.f32 %v836_v15, 0.0  ;;  %v840_v51 = vadd.f32 %v839_v59, %v3280_v10  ;;  %v3384_v58 = vpop.permute.xlu0 %442  ;;  %v3389_v50 = vpop.permute.xlu1 %447 }
 0x127   : > { %v1803_v12 = vadd.f32 %v3301_v53, %v1545_v6  ;;  %v1553_v47 = vmax.f32 %v991_v9, 0.0  ;;  %2583 = vmatmul.mubr.msk.bf16.gmra.mrb[132].mxu1 %vm690_vm0, %v2883_v25  ;;  %v1615_v62 = vmax.f32 %v838_v52, 0.0  ;;  %4161 = vst [vmem:[#allocation23_spill] sm:$0xff] %v3384_v58 }
 0x128   : > { %v1554_v49 = vmax.f32 %v993_v1, 0.0  ;;  %1490 = vmatprep.mubr.bf16.mxu1 %v4159_v3  ;;  %v3382_v45 = vadd.f32 %v1608_v54, %v1607_v19  ;;  %v1616_v57 = vmax.f32 %v840_v51, 0.0 }
 0x129   : > { %v3386_v55 = vadd.f32 %v1803_v12, %v1546_v17  ;;  %v1804_v15 = vadd.f32 %v3307_v60, %v1553_v47 }
 0x12a   : > { %v996_v53 = vpop.f32.mrb[28].mxu1  ;;  %v3391_v6 = vadd.f32 %v1616_v57, %v1615_v62  ;;  %v843_v9 = vpop.f32.mrb[28].mxu0 }
 0x12b   : > { %v3393_v25 = vadd.f32 %v1804_v15, %v1554_v49  ;;  %v997_v52 = vadd.f32 %v996_v53, %v3200_v34  ;;  %v998_v59 = vpop.f32.mrb[29].mxu1  ;;  %v845_v19 = vpop.f32.mrb[29].mxu0  ;;  %v844_v1 = vadd.f32 %v843_v9, %v3384_v58 }
 0x12c   : > { %v999_v54 = vadd.f32 %v998_v59, %v3200_v34  ;;  %v1000_v17 = vpop.f32.mrb[30].mxu1  ;;  %v847_v51 = vpop.f32.mrb[30].mxu0  ;;  %v846_v47 = vadd.f32 %v845_v19, %v3384_v58 }
 0x12d   : > { %v1561_v60 = vmax.f32 %v997_v52, 0.0  ;;  %v1001_v12 = vadd.f32 %v1000_v17, %v3202_v35  ;;  %v1002_v62 = vpop.f32.mrb[31].mxu1  ;;  %v849_v57 = vpop.f32.mrb[31].mxu0  ;;  %v1623_v4 = vmax.f32 %v844_v1, 0.0  ;;  %v848_v49 = vadd.f32 %v847_v51, %v3389_v50 }
 0x12e   : > { %v1562_v15 = vmax.f32 %v999_v54, 0.0  ;;  %v1003_v53 = vadd.f32 %v1002_v62, %v3202_v35  ;;  %v1624_v42 = vmax.f32 %v846_v47, 0.0  ;;  %v850_v9 = vadd.f32 %v849_v57, %v3389_v50 }
 0x12f   : > { %v1805_v59 = vadd.f32 %v3322_v63, %v1561_v60  ;;  %v1569_v41 = vmax.f32 %v1001_v12, 0.0  ;;  %2584 = vmatmul.mubr.msk.bf16.gmra.mrb[136].mxu1 %vm690_vm0, %v2916_v39  ;;  %v1631_v52 = vmax.f32 %v848_v49, 0.0 }
 0x130   : > { %v1570_v19 = vmax.f32 %v1003_v53, 0.0  ;;  %1500 = vmatprep.mubr.bf16.mxu1 %v4159_v3  ;;  %v3407_v17 = vadd.f32 %v1624_v42, %v1623_v4  ;;  %v1632_v1 = vmax.f32 %v850_v9, 0.0 }
 0x131   : > { %v3409_v51 = vadd.f32 %v1805_v59, %v1562_v15  ;;  %v1806_v54 = vadd.f32 %v3326_v16, %v1569_v41 }
 0x132   : > { %v1006_v47 = vpop.f32.mrb[32].mxu1  ;;  %v853_v62 = vpop.f32.mrb[32].mxu0  ;;  %v3412_v57 = vadd.f32 %v1632_v1, %v1631_v52 }
 0x133   : > { %v3414_v63 = vadd.f32 %v1806_v54, %v1570_v19  ;;  %v1007_v60 = vadd.f32 %v1006_v47, %v3214_v38  ;;  %v1008_v39 = vpop.f32.mrb[33].mxu1  ;;  %v854_v12 = vadd.f32 %v853_v62, %v3140_v20  ;;  %v855_v49 = vpop.f32.mrb[33].mxu0 }
 0x134   : > { %v1009_v42 = vadd.f32 %v1008_v39, %v3214_v38  ;;  %v1010_v4 = vpop.f32.mrb[34].mxu1  ;;  %v856_v3 = vadd.f32 %v855_v49, %v3140_v20  ;;  %v857_v15 = vpop.f32.mrb[34].mxu0 }
 0x135   : > { %v1577_v53 = vmax.f32 %v1007_v60, 0.0  ;;  %v1011_v41 = vadd.f32 %v1010_v4, %v3216_v40  ;;  %v1012_v16 = vpop.f32.mrb[35].mxu1  ;;  %v1639_v9 = vmax.f32 %v854_v12, 0.0  ;;  %v858_v59 = vadd.f32 %v857_v15, %v3146_v22  ;;  %v859_v52 = vpop.f32.mrb[35].mxu0 }
 0x136   : > { %v1578_v19 = vmax.f32 %v1009_v42, 0.0  ;;  %v1013_v1 = vadd.f32 %v1012_v16, %v3216_v40  ;;  %v1640_v54 = vmax.f32 %v856_v3, 0.0  ;;  %v860_v47 = vadd.f32 %v859_v52, %v3146_v22 }
 0x137   : > { %v1807_v62 = vadd.f32 %v3340_v18, %v1577_v53  ;;  %v1585_v39 = vmax.f32 %v1011_v41, 0.0  ;;  %2585 = vmatmul.mubr.msk.bf16.gmra.mrb[140].mxu1 %vm690_vm0, %v2945_v48  ;;  %v1647_v60 = vmax.f32 %v858_v59, 0.0 }
 0x138   : > { %v1586_v49 = vmax.f32 %v1013_v1, 0.0  ;;  %v3427_v4 = vadd.f32 %v1640_v54, %v1639_v9  ;;  %v1648_v12 = vmax.f32 %v860_v47, 0.0 }
 0x139   : > { %v3429_v14 = vadd.f32 %v1807_v62, %v1578_v19  ;;  %v1808_v42 = vadd.f32 %v3345_v61, %v1585_v39 }
 0x13a   : > { %v1016_v15 = vpop.f32.mrb[36].mxu1  ;;  %v3432_v16 = vadd.f32 %v1648_v12, %v1647_v60  ;;  %v863_v3 = vpop.f32.mrb[36].mxu0 }
 0x13b   : > { %4162 = vst [vmem:[#allocation24_spill] sm:$0xff] %v3429_v14  ;;  %v3434_v52 = vadd.f32 %v1808_v42, %v1586_v49  ;;  %v1017_v18 = vadd.f32 %v1016_v15, %v3234_v43  ;;  %v1018_v53 = vpop.f32.mrb[37].mxu1  ;;  %v864_v48 = vadd.f32 %v863_v3, %v3156_v26  ;;  %v865_v41 = vpop.f32.mrb[37].mxu0 }
 0x13c   : > { %v1019_v9 = vadd.f32 %v1018_v53, %v3234_v43  ;;  %v1020_v59 = vpop.f32.mrb[38].mxu1  ;;  %v866_v19 = vadd.f32 %v865_v41, %v3156_v26  ;;  %v867_v1 = vpop.f32.mrb[38].mxu0 }
 0x13d   : > { %4163 = vst [vmem:[#allocation25_spill] sm:$0xff] %v3434_v52  ;;  %v1593_v54 = vmax.f32 %v1017_v18, 0.0  ;;  %v1021_v61 = vadd.f32 %v1020_v59, %v3236_v44  ;;  %v1022_v47 = vpop.f32.mrb[39].mxu1  ;;  %v1655_v62 = vmax.f32 %v864_v48, 0.0  ;;  %v868_v39 = vadd.f32 %v867_v1, %v3158_v27  ;;  %v869_v60 = vpop.f32.mrb[39].mxu0 }
 0x13e   : > { %v1594_v49 = vmax.f32 %v1019_v9, 0.0  ;;  %v1023_v12 = vadd.f32 %v1022_v47, %v3236_v44  ;;  %v1656_v42 = vmax.f32 %v866_v19, 0.0  ;;  %v870_v15 = vadd.f32 %v869_v60, %v3158_v27 }
 0x13f   : > { %v1809_v3 = vadd.f32 %v3361_v13, %v1593_v54  ;;  %v1601_v53 = vmax.f32 %v1021_v61, 0.0  ;;  %v1663_v43 = vmax.f32 %v868_v39, 0.0 }
 0x140   : > { %v1602_v41 = vmax.f32 %v1023_v12, 0.0  ;;  %v3445_v52 = vadd.f32 %v1656_v42, %v1655_v62  ;;  %v1664_v18 = vmax.f32 %v870_v15, 0.0 }
 0x141   : > { %v3447_v59 = vadd.f32 %v1809_v3, %v1594_v49  ;;  %v1810_v48 = vadd.f32 %v3366_v56, %v1601_v53 }
 0x142   : > { %v1026_v1 = vpop.f32.mrb[40].mxu1  ;;  %v3450_v14 = vadd.f32 %v1664_v18, %v1663_v43  ;;  %v873_v9 = vpop.f32.mrb[40].mxu0 }
 0x143   : > { %v3452_v47 = vadd.f32 %v1810_v48, %v1602_v41  ;;  %v1027_v19 = vadd.f32 %v1026_v1, %v3278_v46  ;;  %v1028_v60 = vpop.f32.mrb[41].mxu1  ;;  %v874_v13 = vadd.f32 %v873_v9, %v3174_v30  ;;  %v875_v54 = vpop.f32.mrb[41].mxu0 }
 0x144   : > { %v1029_v61 = vadd.f32 %v1028_v60, %v3278_v46  ;;  %v1030_v62 = vpop.f32.mrb[42].mxu1  ;;  %v876_v39 = vadd.f32 %v875_v54, %v3174_v30  ;;  %v877_v49 = vpop.f32.mrb[42].mxu0 }
 0x145   : > { %4164 = vst [vmem:[#allocation26_spill] sm:$0xff] %v3452_v47  ;;  %v1609_v12 = vmax.f32 %v1027_v19, 0.0  ;;  %v1031_v56 = vadd.f32 %v1030_v62, %v3280_v10  ;;  %v1032_v43 = vpop.f32.mrb[43].mxu1  ;;  %v1671_v42 = vmax.f32 %v874_v13, 0.0  ;;  %v878_v15 = vadd.f32 %v877_v49, %v3176_v31  ;;  %v879_v3 = vpop.f32.mrb[43].mxu0 }
 0x146   : > { %v1610_v53 = vmax.f32 %v1029_v61, 0.0  ;;  %v1033_v41 = vadd.f32 %v1032_v43, %v3280_v10  ;;  %v1672_v18 = vmax.f32 %v876_v39, 0.0  ;;  %v880_v48 = vadd.f32 %v879_v3, %v3176_v31 }
 0x147   : > { %v1811_v1 = vadd.f32 %v3382_v45, %v1609_v12  ;;  %v1617_v9 = vmax.f32 %v1031_v56, 0.0  ;;  %v1679_v60 = vmax.f32 %v878_v15, 0.0 }
 0x148   : > { %v1618_v54 = vmax.f32 %v1033_v41, 0.0  ;;  %v3463_v46 = vadd.f32 %v1672_v18, %v1671_v42  ;;  %v1680_v19 = vmax.f32 %v880_v48, 0.0 }
 0x149   : > { %v3465_v62 = vadd.f32 %v1811_v1, %v1610_v53  ;;  %v1812_v13 = vadd.f32 %v3391_v6, %v1617_v9 }
 0x14a   : > { %v1036_v49 = vpop.f32.mrb[44].mxu1  ;;  %v3468_v47 = vadd.f32 %v1680_v19, %v1679_v60  ;;  %v883_v61 = vpop.f32.mrb[44].mxu0 }
 0x14b   : > { %v3470_v43 = vadd.f32 %v1812_v13, %v1618_v54  ;;  %v1037_v39 = vadd.f32 %v1036_v49, %v3384_v58  ;;  %v1038_v3 = vpop.f32.mrb[45].mxu1  ;;  %v884_v45 = vadd.f32 %v883_v61, %v3190_v24  ;;  %v885_v12 = vpop.f32.mrb[45].mxu0 }
 0x14c   : > { %v1039_v56 = vadd.f32 %v1038_v3, %v3384_v58  ;;  %v1040_v42 = vpop.f32.mrb[46].mxu1  ;;  %v886_v15 = vadd.f32 %v885_v12, %v3190_v24  ;;  %v887_v53 = vpop.f32.mrb[46].mxu0 }
 0x14d   : > { %4165 = vst [vmem:[#allocation27_spill] sm:$0xff] %v3470_v43  ;;  %v1625_v41 = vmax.f32 %v1037_v39, 0.0  ;;  %v1041_v6 = vadd.f32 %v1040_v42, %v3389_v50  ;;  %v1042_v18 = vpop.f32.mrb[47].mxu1  ;;  %v1687_v48 = vmax.f32 %v884_v45, 0.0  ;;  %v888_v1 = vadd.f32 %v887_v53, %v3192_v33  ;;  %v889_v9 = vpop.f32.mrb[47].mxu0 }
 0x14e   : > { %v1626_v60 = vmax.f32 %v1039_v56, 0.0  ;;  %v1043_v54 = vadd.f32 %v1042_v18, %v3389_v50  ;;  %v1688_v19 = vmax.f32 %v886_v15, 0.0  ;;  %v890_v13 = vadd.f32 %v889_v9, %v3192_v33 }
 0x14f   : > { %v1813_v49 = vadd.f32 %v3407_v17, %v1625_v41  ;;  %v1633_v61 = vmax.f32 %v1041_v6, 0.0  ;;  %v1695_v3 = vmax.f32 %v888_v1, 0.0 }
 0x150   : > { %v1634_v12 = vmax.f32 %v1043_v54, 0.0  ;;  %v3481_v58 = vadd.f32 %v1688_v19, %v1687_v48  ;;  %v1696_v39 = vmax.f32 %v890_v13, 0.0 }
 0x151   : > { %v3483_v42 = vadd.f32 %v1813_v49, %v1626_v60  ;;  %v1814_v45 = vadd.f32 %v3412_v57, %v1633_v61 }
 0x152   : > { %v3486_v53 = vadd.f32 %v1696_v39, %v1695_v3  ;;  %v1046_v56 = vpop.f32.mrb[48].mxu1  ;;  %v1159_v43 = vpop.f32.mrb[48].mxu0 }
 0x153   : > { %v3488_v18 = vadd.f32 %v1814_v45, %v1634_v12  ;;  %v1047_v15 = vadd.f32 %v1046_v56, %v3140_v20  ;;  %v1160_v17 = vadd.f32 %v1159_v43, %v3142_v21  ;;  %v1048_v41 = vpop.f32.mrb[49].mxu1  ;;  %v1161_v6 = vpop.f32.mrb[49].mxu0 }
 0x154   : > { %v1049_v48 = vadd.f32 %v1048_v41, %v3140_v20  ;;  %v1162_v1 = vadd.f32 %v1161_v6, %v3142_v21  ;;  %v1050_v9 = vpop.f32.mrb[50].mxu1  ;;  %v1163_v60 = vpop.f32.mrb[50].mxu0 }
 0x155   : > { %v1641_v54 = vmax.f32 %v1047_v15, 0.0  ;;  %v1515_v57 = vmax.f32 %v1160_v17, 0.0  ;;  %v1051_v19 = vadd.f32 %v1050_v9, %v3146_v22  ;;  %v1164_v13 = vadd.f32 %v1163_v60, %v3148_v23  ;;  %v1052_v49 = vpop.f32.mrb[51].mxu1  ;;  %v1165_v61 = vpop.f32.mrb[51].mxu0 }
 0x156   : > { %v1642_v3 = vmax.f32 %v1049_v48, 0.0  ;;  %v1516_v12 = vmax.f32 %v1162_v1, 0.0  ;;  %v1053_v43 = vadd.f32 %v1052_v49, %v3146_v22  ;;  %v1166_v39 = vadd.f32 %v1165_v61, %v3148_v23 }
 0x157   : > { %v1815_v45 = vadd.f32 %v3427_v4, %v1641_v54  ;;  %v1863_v56 = vadd.f32 %v3342_v0, %v1515_v57  ;;  %v1649_v41 = vmax.f32 %v1051_v19, 0.0  ;;  %v1523_v6 = vmax.f32 %v1164_v13, 0.0 }
 0x158   : > { %v1650_v15 = vmax.f32 %v1053_v43, 0.0  ;;  %v1524_v17 = vmax.f32 %v1166_v39, 0.0 }
 0x159   : > { %v3500_v21 = vadd.f32 %v1815_v45, %v1642_v3  ;;  %v3502_v9 = vadd.f32 %v1863_v56, %v1516_v12  ;;  %v1816_v60 = vadd.f32 %v3432_v16, %v1649_v41  ;;  %v1864_v48 = vadd.f32 %v3347_v7, %v1523_v6 }
 0x15a   : > { %v1056_v1 = vpop.f32.mrb[52].mxu1  ;;  %v1169_v49 = vpop.f32.mrb[52].mxu0 }
 0x15b   : > { %v3506_v22 = vadd.f32 %v1816_v60, %v1650_v15  ;;  %v3508_v61 = vadd.f32 %v1864_v48, %v1524_v17  ;;  %v1057_v0 = vadd.f32 %v1056_v1, %v3156_v26  ;;  %v1170_v4 = vadd.f32 %v1169_v49, %v3166_v28  ;;  %v1058_v54 = vpop.f32.mrb[53].mxu1  ;;  %v1171_v57 = vpop.f32.mrb[53].mxu0 }
 0x15c   : > { %v1059_v19 = vadd.f32 %v1058_v54, %v3156_v26  ;;  %v1172_v13 = vadd.f32 %v1171_v57, %v3166_v28  ;;  %v1060_v3 = vpop.f32.mrb[54].mxu1  ;;  %v1173_v16 = vpop.f32.mrb[54].mxu0 }
 0x15d   : > { %v1657_v12 = vmax.f32 %v1057_v0, 0.0  ;;  %v1531_v7 = vmax.f32 %v1170_v4, 0.0  ;;  %v1061_v43 = vadd.f32 %v1060_v3, %v3158_v27  ;;  %v1174_v39 = vadd.f32 %v1173_v16, %v3168_v29  ;;  %v1062_v45 = vpop.f32.mrb[55].mxu1  ;;  %v1175_v56 = vpop.f32.mrb[55].mxu0 }
 0x15e   : > { %v1658_v41 = vmax.f32 %v1059_v19, 0.0  ;;  %v1532_v6 = vmax.f32 %v1172_v13, 0.0  ;;  %v1063_v15 = vadd.f32 %v1062_v45, %v3158_v27  ;;  %v1176_v17 = vadd.f32 %v1175_v56, %v3168_v29 }
 0x15f   : > { %v1817_v60 = vadd.f32 %v3445_v52, %v1657_v12  ;;  %v1865_v48 = vadd.f32 %v3363_v2, %v1531_v7  ;;  %v1665_v1 = vmax.f32 %v1061_v43, 0.0  ;;  %v1539_v49 = vmax.f32 %v1174_v39, 0.0 }
 0x160   : > { %v1666_v0 = vmax.f32 %v1063_v15, 0.0  ;;  %v1540_v4 = vmax.f32 %v1176_v17, 0.0 }
 0x161   : > { %v3520_v54 = vadd.f32 %v1817_v60, %v1658_v41  ;;  %v3522_v57 = vadd.f32 %v1865_v48, %v1532_v6  ;;  %v1818_v3 = vadd.f32 %v3450_v14, %v1665_v1  ;;  %v1866_v19 = vadd.f32 %v3368_v8, %v1539_v49 }
 0x162   : > { %v1066_v13 = vpop.f32.mrb[56].mxu1  ;;  %v1179_v16 = vpop.f32.mrb[56].mxu0 }
 0x163   : > { %v3526_v45 = vadd.f32 %v1818_v3, %v1666_v0  ;;  %v3528_v56 = vadd.f32 %v1866_v19, %v1540_v4  ;;  %v1067_v2 = vadd.f32 %v1066_v13, %v3174_v30  ;;  %v1180_v52 = vadd.f32 %v1179_v16, %v3180_v11  ;;  %v1068_v12 = vpop.f32.mrb[57].mxu1  ;;  %v1181_v7 = vpop.f32.mrb[57].mxu0 }
 0x164   : > { %v1069_v43 = vadd.f32 %v1068_v12, %v3174_v30  ;;  %v1182_v39 = vadd.f32 %v1181_v7, %v3180_v11  ;;  %v1070_v41 = vpop.f32.mrb[58].mxu1  ;;  %v1183_v14 = vpop.f32.mrb[58].mxu0 }
 0x165   : > { %v1673_v6 = vmax.f32 %v1067_v2, 0.0  ;;  %v1547_v8 = vmax.f32 %v1180_v52, 0.0  ;;  %v1071_v15 = vadd.f32 %v1070_v41, %v3176_v31  ;;  %v1184_v17 = vadd.f32 %v1183_v14, %v3182_v32  ;;  %v1072_v60 = vpop.f32.mrb[59].mxu1  ;;  %v1185_v48 = vpop.f32.mrb[59].mxu0 }
 0x166   : > { %v1674_v1 = vmax.f32 %v1069_v43, 0.0  ;;  %v1548_v49 = vmax.f32 %v1182_v39, 0.0  ;;  %v1073_v0 = vadd.f32 %v1072_v60, %v3176_v31  ;;  %v1186_v4 = vadd.f32 %v1185_v48, %v3182_v32 }
 0x167   : > { %v1819_v3 = vadd.f32 %v3463_v46, %v1673_v6  ;;  %v1867_v19 = vadd.f32 %v3386_v55, %v1547_v8  ;;  %v1681_v13 = vmax.f32 %v1071_v15, 0.0  ;;  %v1555_v16 = vmax.f32 %v1184_v17, 0.0 }
 0x168   : > { %v1682_v2 = vmax.f32 %v1073_v0, 0.0  ;;  %v1556_v52 = vmax.f32 %v1186_v4, 0.0 }
 0x169   : > { %v3540_v12 = vadd.f32 %v1819_v3, %v1674_v1  ;;  %v3542_v7 = vadd.f32 %v1867_v19, %v1548_v49  ;;  %v1820_v41 = vadd.f32 %v3468_v47, %v1681_v13  ;;  %v1868_v43 = vadd.f32 %v3393_v25, %v1555_v16 }
 0x16a   : > { %v1076_v39 = vpop.f32.mrb[60].mxu1  ;;  %v1189_v14 = vpop.f32.mrb[60].mxu0 }
 0x16b   : > { %v3546_v60 = vadd.f32 %v1820_v41, %v1682_v2  ;;  %v3548_v48 = vadd.f32 %v1868_v43, %v1556_v52  ;;  %v1077_v46 = vadd.f32 %v1076_v39, %v3190_v24  ;;  %v1190_v55 = vadd.f32 %v1189_v14, %v3200_v34  ;;  %v1078_v6 = vpop.f32.mrb[61].mxu1  ;;  %v1191_v8 = vpop.f32.mrb[61].mxu0 }
 0x16c   : > { %v1079_v15 = vadd.f32 %v1078_v6, %v3190_v24  ;;  %v1192_v17 = vadd.f32 %v1191_v8, %v3200_v34  ;;  %v1080_v1 = vpop.f32.mrb[62].mxu1  ;;  %v1193_v47 = vpop.f32.mrb[62].mxu0 }
 0x16d   : > { %v1689_v49 = vmax.f32 %v1077_v46, 0.0  ;;  %v1563_v25 = vmax.f32 %v1190_v55, 0.0  ;;  %v1081_v0 = vadd.f32 %v1080_v1, %v3192_v33  ;;  %v1194_v4 = vadd.f32 %v1193_v47, %v3202_v35  ;;  %v1082_v3 = vpop.f32.mrb[63].mxu1  ;;  %v1195_v19 = vpop.f32.mrb[63].mxu0 }
 0x16e   : > { %v1690_v13 = vmax.f32 %v1079_v15, 0.0  ;;  %v1564_v16 = vmax.f32 %v1192_v17, 0.0  ;;  %v1083_v2 = vadd.f32 %v1082_v3, %v3192_v33  ;;  %v1196_v52 = vadd.f32 %v1195_v19, %v3202_v35 }
 0x16f   : > { %v1821_v41 = vadd.f32 %v3481_v58, %v1689_v49  ;;  %v1869_v43 = vadd.f32 %v3409_v51, %v1563_v25  ;;  %v1697_v39 = vmax.f32 %v1081_v0, 0.0  ;;  %v1571_v14 = vmax.f32 %v1194_v4, 0.0 }
 0x170   : > { %v1698_v46 = vmax.f32 %v1083_v2, 0.0  ;;  %v1572_v55 = vmax.f32 %v1196_v52, 0.0 }
 0x171   : > { %v3560_v6 = vadd.f32 %v1821_v41, %v1690_v13  ;;  %v3562_v8 = vadd.f32 %v1869_v43, %v1564_v16  ;;  %v1822_v1 = vadd.f32 %v3486_v53, %v1697_v39  ;;  %v1870_v15 = vadd.f32 %v3414_v63, %v1571_v14 }
 0x172   : > { %v1086_v17 = vpop.f32.mrb[64].mxu1  ;;  %v1199_v47 = vpop.f32.mrb[64].mxu0 }
 0x173   : > { %v3566_v3 = vadd.f32 %v1822_v1, %v1698_v46  ;;  %v3568_v19 = vadd.f32 %v1870_v15, %v1572_v55  ;;  %v1087_v58 = vadd.f32 %v1086_v17, %v3208_v36  ;;  %v1200_v51 = vadd.f32 %v1199_v47, %v3214_v38  ;;  %v1088_v49 = vpop.f32.mrb[65].mxu1  ;;  %v1201_v25 = vpop.f32.mrb[65].mxu0  ;;  %v4166_v15 = vld [vmem:[#allocation24_spill] sm:$0xff] }
 0x174   : > { %v1089_v0 = vadd.f32 %v1088_v49, %v3208_v36  ;;  %v1202_v4 = vadd.f32 %v1201_v25, %v3214_v38  ;;  %v1090_v13 = vpop.f32.mrb[66].mxu1  ;;  %v1203_v53 = vpop.f32.mrb[66].mxu0 }
 0x175   : > { %v1705_v16 = vmax.f32 %v1087_v58, 0.0  ;;  %v1579_v63 = vmax.f32 %v1200_v51, 0.0  ;;  %v1091_v2 = vadd.f32 %v1090_v13, %v3210_v37  ;;  %v1204_v52 = vadd.f32 %v1203_v53, %v3216_v40  ;;  %v1092_v41 = vpop.f32.mrb[67].mxu1  ;;  %v1205_v43 = vpop.f32.mrb[67].mxu0  ;;  %v4168_v53 = vld [vmem:[#allocation13_spill] sm:$0xff] }
 0x176   : > { %v1706_v39 = vmax.f32 %v1089_v0, 0.0  ;;  %v1580_v14 = vmax.f32 %v1202_v4, 0.0  ;;  %v1093_v46 = vadd.f32 %v1092_v41, %v3210_v37  ;;  %v1206_v55 = vadd.f32 %v1205_v43, %v3216_v40  ;;  %v4169_v0 = vld [vmem:[#allocation25_spill] sm:$0xff] }
 0x177   : > { %v1823_v1 = vadd.f32 %v3250_v5, %v1705_v16  ;;  %v1871_v17 = vadd.f32 %v4166_v15, %v1579_v63  ;;  %v1713_v47 = vmax.f32 %v1091_v2, 0.0  ;;  %v1587_v49 = vmax.f32 %v1204_v52, 0.0  ;;  %v4172_v5 = vld [vmem:[#allocation8_spill] sm:$0xff]  ;;  %v4173_v63 = vld [vmem:[#allocation10_spill] sm:$0xff] }
 0x178   : > { %v1714_v58 = vmax.f32 %v1093_v46, 0.0  ;;  %v1588_v51 = vmax.f32 %v1206_v55, 0.0 }
 0x179   : > { %v3580_v25 = vadd.f32 %v1823_v1, %v1706_v39  ;;  %v3582_v13 = vadd.f32 %v1871_v17, %v1580_v14  ;;  %v1824_v38 = vadd.f32 %v4168_v53, %v1713_v47  ;;  %v1872_v4 = vadd.f32 %v4169_v0, %v1587_v49  ;;  %v4174_v47 = vld [vmem:[#allocation9_spill] sm:$0xff] }
 0x17a   : > { %v1096_v36 = vpop.f32.mrb[68].mxu1  ;;  %v1209_v41 = vpop.f32.mrb[68].mxu0 }
 0x17b   : > { %4167 = vst [vmem:[#allocation24_spill] sm:$0xff] %v3582_v13  ;;  %v3586_v37 = vadd.f32 %v1824_v38, %v1714_v58  ;;  %v3588_v43 = vadd.f32 %v1872_v4, %v1588_v51  ;;  %v1097_v16 = vadd.f32 %v1096_v36, %v4172_v5  ;;  %v1210_v2 = vadd.f32 %v1209_v41, %v4173_v63  ;;  %v1098_v52 = vpop.f32.mrb[69].mxu1  ;;  %v1211_v46 = vpop.f32.mrb[69].mxu0  ;;  %v4175_v41 = vld [vmem:[#allocation14_spill] sm:$0xff] }
 0x17c   : > { %v1099_v39 = vadd.f32 %v1098_v52, %v4172_v5  ;;  %v1212_v14 = vadd.f32 %v1211_v46, %v4173_v63  ;;  %v1100_v55 = vpop.f32.mrb[70].mxu1  ;;  %v1213_v1 = vpop.f32.mrb[70].mxu0 }
 0x17d   : > { %4170 = vst [vmem:[#allocation13_spill] sm:$0xff] %v3586_v37  ;;  %4171 = vst [vmem:[#allocation25_spill] sm:$0xff] %v3588_v43  ;;  %v1721_v15 = vmax.f32 %v1097_v16, 0.0  ;;  %v1595_v17 = vmax.f32 %v1210_v2, 0.0  ;;  %v1101_v49 = vadd.f32 %v1100_v55, %v4174_v47  ;;  %v1214_v38 = vadd.f32 %v1213_v1, %v3236_v44  ;;  %v1102_v58 = vpop.f32.mrb[71].mxu1  ;;  %v1215_v51 = vpop.f32.mrb[71].mxu0 }
 0x17e   : > { %v1722_v53 = vmax.f32 %v1099_v39, 0.0  ;;  %v1596_v36 = vmax.f32 %v1212_v14, 0.0  ;;  %v1103_v0 = vadd.f32 %v1102_v58, %v4174_v47  ;;  %v1216_v4 = vadd.f32 %v1215_v51, %v3236_v44  ;;  %v4177_v1 = vld [vmem:[#allocation16_spill] sm:$0xff]  ;;  %v4178_v39 = vld [vmem:[#allocation26_spill] sm:$0xff] }
 0x17f   : > { %v1825_v52 = vadd.f32 %v4175_v41, %v1721_v15  ;;  %v1873_v46 = vadd.f32 %v3447_v59, %v1595_v17  ;;  %v1729_v63 = vmax.f32 %v1101_v49, 0.0  ;;  %v1603_v5 = vmax.f32 %v1214_v38, 0.0  ;;  %v4181_v15 = vld [vmem:[#allocation11_spill] sm:$0xff] }
 0x180   : > { %v1730_v16 = vmax.f32 %v1103_v0, 0.0  ;;  %v1604_v2 = vmax.f32 %v1216_v4, 0.0  ;;  %v4182_v17 = vld [vmem:[#allocation15_spill] sm:$0xff] }
 0x181   : > { %v3600_v43 = vadd.f32 %v1825_v52, %v1722_v53  ;;  %v3602_v55 = vadd.f32 %v1873_v46, %v1596_v36  ;;  %v1826_v37 = vadd.f32 %v4177_v1, %v1729_v63  ;;  %v1874_v14 = vadd.f32 %v4178_v39, %v1603_v5  ;;  %v4183_v52 = vld [vmem:[#allocation12_spill] sm:$0xff] }
 0x182   : > { %v1106_v13 = vpop.f32.mrb[72].mxu1  ;;  %v1219_v58 = vpop.f32.mrb[72].mxu0 }
 0x183   : > { %4176 = vst [vmem:[#allocation14_spill] sm:$0xff] %v3602_v55  ;;  %v3606_v47 = vadd.f32 %v1826_v37, %v1730_v16  ;;  %v3608_v51 = vadd.f32 %v1874_v14, %v1604_v2  ;;  %v1107_v59 = vadd.f32 %v1106_v13, %v4181_v15  ;;  %v1220_v49 = vadd.f32 %v1219_v58, %v4182_v17  ;;  %v1108_v38 = vpop.f32.mrb[73].mxu1  ;;  %v1221_v0 = vpop.f32.mrb[73].mxu0  ;;  %v4184_v58 = vld [vmem:[#allocation17_spill] sm:$0xff] }
 0x184   : > { %v1109_v53 = vadd.f32 %v1108_v38, %v4181_v15  ;;  %v1222_v36 = vadd.f32 %v1221_v0, %v4182_v17  ;;  %v1110_v4 = vpop.f32.mrb[74].mxu1  ;;  %v1223_v63 = vpop.f32.mrb[74].mxu0 }
 0x185   : > { %4179 = vst [vmem:[#allocation16_spill] sm:$0xff] %v3606_v47  ;;  %4180 = vst [vmem:[#allocation26_spill] sm:$0xff] %v3608_v51  ;;  %v1737_v41 = vmax.f32 %v1107_v59, 0.0  ;;  %v1611_v5 = vmax.f32 %v1220_v49, 0.0  ;;  %v1111_v46 = vadd.f32 %v1110_v4, %v4183_v52  ;;  %v1224_v37 = vadd.f32 %v1223_v63, %v3280_v10  ;;  %v1112_v16 = vpop.f32.mrb[75].mxu1  ;;  %v1225_v2 = vpop.f32.mrb[75].mxu0 }
 0x186   : > { %v1738_v1 = vmax.f32 %v1109_v53, 0.0  ;;  %v1612_v13 = vmax.f32 %v1222_v36, 0.0  ;;  %v1113_v39 = vadd.f32 %v1112_v16, %v4183_v52  ;;  %v1226_v14 = vadd.f32 %v1225_v2, %v3280_v10  ;;  %v4185_v63 = vld [vmem:[#allocation20_spill] sm:$0xff]  ;;  %v4186_v53 = vld [vmem:[#allocation27_spill] sm:$0xff] }
 0x187   : > { %v1827_v38 = vadd.f32 %v4184_v58, %v1737_v41  ;;  %v1875_v0 = vadd.f32 %v3465_v62, %v1611_v5  ;;  %v1745_v17 = vmax.f32 %v1111_v46, 0.0  ;;  %v1619_v15 = vmax.f32 %v1224_v37, 0.0  ;;  %v4189_v41 = vld [vmem:[#allocation18_spill] sm:$0xff]  ;;  %v4190_v5 = vld [vmem:[#allocation23_spill] sm:$0xff] }
 0x188   : > { %v1746_v59 = vmax.f32 %v1113_v39, 0.0  ;;  %v1620_v49 = vmax.f32 %v1226_v14, 0.0 }
 0x189   : > { %v3620_v51 = vadd.f32 %v1827_v38, %v1738_v1  ;;  %v3622_v4 = vadd.f32 %v1875_v0, %v1612_v13  ;;  %v1828_v47 = vadd.f32 %v4185_v63, %v1745_v17  ;;  %v1876_v36 = vadd.f32 %v4186_v53, %v1619_v15  ;;  %v4191_v38 = vld [vmem:[#allocation19_spill] sm:$0xff] }
 0x18a   : > { %v1116_v55 = vpop.f32.mrb[76].mxu1  ;;  %v1229_v16 = vpop.f32.mrb[76].mxu0 }
 0x18b   : > { %v3626_v52 = vadd.f32 %v1828_v47, %v1746_v59  ;;  %v3628_v2 = vadd.f32 %v1876_v36, %v1620_v49  ;;  %v1117_v62 = vadd.f32 %v1116_v55, %v4189_v41  ;;  %v1230_v46 = vadd.f32 %v1229_v16, %v4190_v5  ;;  %v1118_v37 = vpop.f32.mrb[77].mxu1  ;;  %v1231_v39 = vpop.f32.mrb[77].mxu0  ;;  %v4192_v16 = vld [vmem:[#allocation21_spill] sm:$0xff] }
 0x18c   : > { %v1119_v1 = vadd.f32 %v1118_v37, %v4189_v41  ;;  %v1232_v13 = vadd.f32 %v1231_v39, %v4190_v5  ;;  %v1120_v14 = vpop.f32.mrb[78].mxu1  ;;  %v1233_v17 = vpop.f32.mrb[78].mxu0 }
 0x18d   : > { %4187 = vst [vmem:[#allocation17_spill] sm:$0xff] %v3626_v52  ;;  %4188 = vst [vmem:[#allocation20_spill] sm:$0xff] %v3628_v2  ;;  %v1753_v58 = vmax.f32 %v1117_v62, 0.0  ;;  %v1627_v15 = vmax.f32 %v1230_v46, 0.0  ;;  %v1121_v0 = vadd.f32 %v1120_v14, %v4191_v38  ;;  %v1234_v47 = vadd.f32 %v1233_v17, %v3389_v50  ;;  %v1122_v59 = vpop.f32.mrb[79].mxu1  ;;  %v1235_v49 = vpop.f32.mrb[79].mxu0 }
 0x18e   : > { %v1754_v63 = vmax.f32 %v1119_v1, 0.0  ;;  %v1628_v55 = vmax.f32 %v1232_v13, 0.0  ;;  %v1123_v53 = vadd.f32 %v1122_v59, %v4191_v38  ;;  %v1236_v36 = vadd.f32 %v1235_v49, %v3389_v50  ;;  %v4193_v17 = vld [vmem:[#allocation22_spill] sm:$0xff] }
 0x18f   : > { %v1829_v37 = vadd.f32 %v4192_v16, %v1753_v58  ;;  %v1877_v39 = vadd.f32 %v3483_v42, %v1627_v15  ;;  %v1761_v5 = vmax.f32 %v1121_v0, 0.0  ;;  %v1635_v41 = vmax.f32 %v1234_v47, 0.0  ;;  %v4194_v58 = vld [vmem:[#allocation3_spill] sm:$0xff] }
 0x190   : > { %v1762_v62 = vmax.f32 %v1123_v53, 0.0  ;;  %v1636_v46 = vmax.f32 %v1236_v36, 0.0 }
 0x191   : > { %v3640_v2 = vadd.f32 %v1829_v37, %v1754_v63  ;;  %v3642_v14 = vadd.f32 %v1877_v39, %v1628_v55  ;;  %v1830_v52 = vadd.f32 %v4193_v17, %v1761_v5  ;;  %v1878_v1 = vadd.f32 %v3488_v18, %v1635_v41  ;;  %v4195_v41 = vld [vmem:[#allocation4_spill] sm:$0xff] }
 0x192   : > { %v1239_v13 = vpop.f32.mrb[80].mxu0  ;;  %v1352_v59 = vpop.f32.mrb[80].mxu1 }
 0x193   : > { %v3646_v38 = vadd.f32 %v1830_v52, %v1762_v62  ;;  %v3648_v49 = vadd.f32 %v1878_v1, %v1636_v46  ;;  %v1240_v42 = vadd.f32 %v1239_v13, %v3140_v20  ;;  %v1353_v15 = vadd.f32 %v1352_v59, %v4194_v58  ;;  %v1241_v0 = vpop.f32.mrb[81].mxu0  ;;  %v1354_v47 = vpop.f32.mrb[81].mxu1 }
 0x194   : > { %v1242_v63 = vadd.f32 %v1241_v0, %v3140_v20  ;;  %v1355_v55 = vadd.f32 %v1354_v47, %v4194_v58  ;;  %v1243_v53 = vpop.f32.mrb[82].mxu0  ;;  %v1356_v5 = vpop.f32.mrb[82].mxu1  ;;  %v2091_v47 = vld [vmem:[%s4093_s3 + $0x8] sm:$0xff] }
 0x195   : > { %v1643_v36 = vmax.f32 %v1240_v42, 0.0  ;;  %v1517_v18 = vmax.f32 %v1353_v15, 0.0  ;;  %v1244_v16 = vadd.f32 %v1243_v53, %v4195_v41  ;;  %v1357_v52 = vadd.f32 %v1356_v5, %v3148_v23  ;;  %v1358_v37 = vpop.f32.mrb[83].mxu1  ;;  %v1245_v39 = vpop.f32.mrb[83].mxu0  ;;  %2218 = vmatprep.mubr.f32.mxu0 %v2091_v47 }
 0x196   : > { %v1644_v62 = vmax.f32 %v1242_v63, 0.0  ;;  %v1518_v46 = vmax.f32 %v1355_v55, 0.0  ;;  %v1359_v17 = vadd.f32 %v1358_v37, %v3148_v23  ;;  %v1246_v1 = vadd.f32 %v1245_v39, %v4195_v41 }
 0x197   : > { %v1879_v13 = vadd.f32 %v3500_v21, %v1643_v36  ;;  %v1927_v59 = vadd.f32 %v3502_v9, %v1517_v18  ;;  %v1651_v58 = vmax.f32 %v1244_v16, 0.0  ;;  %v1525_v0 = vmax.f32 %v1357_v52, 0.0 }
 0x198   : > { %v1526_v42 = vmax.f32 %v1359_v17, 0.0  ;;  %v1652_v15 = vmax.f32 %v1246_v1, 0.0 }
 0x199   : > { %v3663_v53 = vadd.f32 %v1879_v13, %v1644_v62  ;;  %v3665_v63 = vadd.f32 %v1927_v59, %v1518_v46  ;;  %v1880_v23 = vadd.f32 %v3506_v22, %v1651_v58  ;;  %v1928_v55 = vadd.f32 %v3508_v61, %v1525_v0  ;;  %v4209_v61 = vld [vmem:[#allocation16_spill] sm:$0xff] }
 0x19a   : > { %v1249_v21 = vpop.f32.mrb[84].mxu0  ;;  %v1362_v5 = vpop.f32.mrb[84].mxu1 }
 0x19b   : > { %v3669_v9 = vadd.f32 %v1928_v55, %v1526_v42  ;;  %v3671_v36 = vadd.f32 %v1880_v23, %v1652_v15  ;;  %v1250_v18 = vadd.f32 %v1249_v21, %v3156_v26  ;;  %v1363_v16 = vadd.f32 %v1362_v5, %v3166_v28  ;;  %v1251_v52 = vpop.f32.mrb[85].mxu0  ;;  %v1364_v37 = vpop.f32.mrb[85].mxu1 }
 0x19c   : > { %v1252_v39 = vadd.f32 %v1251_v52, %v3156_v26  ;;  %v1365_v62 = vadd.f32 %v1364_v37, %v3166_v28  ;;  %v1253_v22 = vpop.f32.mrb[86].mxu0  ;;  %v1366_v46 = vpop.f32.mrb[86].mxu1 }
 0x19d   : > { %v1659_v17 = vmax.f32 %v1250_v18, 0.0  ;;  %v1533_v1 = vmax.f32 %v1363_v16, 0.0  ;;  %v1254_v13 = vadd.f32 %v1253_v22, %v3158_v27  ;;  %v1368_v59 = vpop.f32.mrb[87].mxu1  ;;  %v1255_v58 = vpop.f32.mrb[87].mxu0  ;;  %v1367_v15 = vadd.f32 %v1366_v46, %v3168_v29 }
 0x19e   : > { %v1660_v0 = vmax.f32 %v1252_v39, 0.0  ;;  %v1534_v42 = vmax.f32 %v1365_v62, 0.0  ;;  %v1369_v47 = vadd.f32 %v1368_v59, %v3168_v29  ;;  %v1256_v21 = vadd.f32 %v1255_v58, %v3158_v27 }
 0x19f   : > { %v1881_v23 = vadd.f32 %v3520_v54, %v1659_v17  ;;  %v1929_v28 = vadd.f32 %v3522_v57, %v1533_v1  ;;  %v1667_v55 = vmax.f32 %v1254_v13, 0.0  ;;  %v1541_v5 = vmax.f32 %v1367_v15, 0.0 }
 0x1a0   : > { %v1542_v18 = vmax.f32 %v1369_v47, 0.0  ;;  %v1668_v39 = vmax.f32 %v1256_v21, 0.0 }
 0x1a1   : > { %v3685_v16 = vadd.f32 %v1881_v23, %v1660_v0  ;;  %v3687_v52 = vadd.f32 %v1929_v28, %v1534_v42  ;;  %v1882_v37 = vadd.f32 %v3526_v45, %v1667_v55  ;;  %v1930_v62 = vadd.f32 %v3528_v56, %v1541_v5 }
 0x1a2   : > { %v1259_v22 = vpop.f32.mrb[88].mxu0  ;;  %v1372_v29 = vpop.f32.mrb[88].mxu1 }
 0x1a3   : > { %v3691_v46 = vadd.f32 %v1882_v37, %v1668_v39  ;;  %v1260_v54 = vadd.f32 %v1259_v22, %v3174_v30  ;;  %v1373_v57 = vadd.f32 %v1372_v29, %v3180_v11  ;;  %v1261_v17 = vpop.f32.mrb[89].mxu0  ;;  %v1374_v1 = vpop.f32.mrb[89].mxu1  ;;  %v3695_v13 = vadd.f32 %v1930_v62, %v1542_v18 }
 0x1a4   : > { %v1262_v59 = vadd.f32 %v1261_v17, %v3174_v30  ;;  %v1375_v58 = vadd.f32 %v1374_v1, %v3180_v11  ;;  %v1263_v45 = vpop.f32.mrb[90].mxu0  ;;  %v1376_v0 = vpop.f32.mrb[90].mxu1 }
 0x1a5   : > { %v1675_v42 = vmax.f32 %v1260_v54, 0.0  ;;  %v1549_v56 = vmax.f32 %v1373_v57, 0.0  ;;  %v1264_v15 = vadd.f32 %v1263_v45, %v3176_v31  ;;  %v1377_v47 = vadd.f32 %v1376_v0, %v3182_v32  ;;  %v1378_v23 = vpop.f32.mrb[91].mxu1  ;;  %v1265_v28 = vpop.f32.mrb[91].mxu0 }
 0x1a6   : > { %v1676_v21 = vmax.f32 %v1262_v59, 0.0  ;;  %v1550_v5 = vmax.f32 %v1375_v58, 0.0  ;;  %v1379_v18 = vadd.f32 %v1378_v23, %v3182_v32  ;;  %v1266_v29 = vadd.f32 %v1265_v28, %v3176_v31 }
 0x1a7   : > { %v1883_v37 = vadd.f32 %v3540_v12, %v1675_v42  ;;  %v1931_v11 = vadd.f32 %v3542_v7, %v1549_v56  ;;  %v1683_v39 = vmax.f32 %v1264_v15, 0.0  ;;  %v1557_v62 = vmax.f32 %v1377_v47, 0.0 }
 0x1a8   : > { %v1558_v22 = vmax.f32 %v1379_v18, 0.0  ;;  %v1684_v59 = vmax.f32 %v1266_v29, 0.0 }
 0x1a9   : > { %v3707_v54 = vadd.f32 %v1883_v37, %v1676_v21  ;;  %v3709_v57 = vadd.f32 %v1931_v11, %v1550_v5  ;;  %v1884_v17 = vadd.f32 %v3546_v60, %v1683_v39  ;;  %v1932_v1 = vadd.f32 %v3548_v48, %v1557_v62 }
 0x1aa   : > { %v1269_v58 = vpop.f32.mrb[92].mxu0  ;;  %v1382_v32 = vpop.f32.mrb[92].mxu1 }
 0x1ab   : > { %v3713_v45 = vadd.f32 %v1932_v1, %v1558_v22  ;;  %v1270_v12 = vadd.f32 %v1269_v58, %v3190_v24  ;;  %v1383_v7 = vadd.f32 %v1382_v32, %v3200_v34  ;;  %v1271_v0 = vpop.f32.mrb[93].mxu0  ;;  %v1384_v42 = vpop.f32.mrb[93].mxu1  ;;  %v3717_v56 = vadd.f32 %v1884_v17, %v1684_v59 }
 0x1ac   : > { %v1272_v15 = vadd.f32 %v1271_v0, %v3190_v24  ;;  %v1385_v47 = vadd.f32 %v1384_v42, %v3200_v34  ;;  %v1273_v60 = vpop.f32.mrb[94].mxu0  ;;  %v1386_v23 = vpop.f32.mrb[94].mxu1 }
 0x1ad   : > { %v1691_v28 = vmax.f32 %v1270_v12, 0.0  ;;  %v1565_v21 = vmax.f32 %v1383_v7, 0.0  ;;  %v1274_v5 = vadd.f32 %v1273_v60, %v3192_v33  ;;  %v1388_v18 = vpop.f32.mrb[95].mxu1  ;;  %v1275_v37 = vpop.f32.mrb[95].mxu0  ;;  %v1387_v62 = vadd.f32 %v1386_v23, %v3202_v35  ;;  %v4197_v60 = vld [vmem:[#allocation7_spill] sm:$0xff] }
 0x1ae   : > { %v1692_v11 = vmax.f32 %v1272_v15, 0.0  ;;  %v1566_v39 = vmax.f32 %v1385_v47, 0.0  ;;  %v1389_v22 = vadd.f32 %v1388_v18, %v3202_v35  ;;  %v1276_v1 = vadd.f32 %v1275_v37, %v3192_v33 }
 0x1af   : > { %v1885_v29 = vadd.f32 %v3560_v6, %v1691_v28  ;;  %v1933_v34 = vadd.f32 %v3562_v8, %v1565_v21  ;;  %v1699_v17 = vmax.f32 %v1274_v5, 0.0  ;;  %v1573_v59 = vmax.f32 %v1387_v62, 0.0  ;;  %v4196_v6 = vld [vmem:[#allocation5_spill] sm:$0xff]  ;;  %v4198_v62 = vld [vmem:[#allocation6_spill] sm:$0xff] }
 0x1b0   : > { %v1574_v58 = vmax.f32 %v1389_v22, 0.0  ;;  %v1700_v0 = vmax.f32 %v1276_v1, 0.0  ;;  %v4202_v1 = vld [vmem:[#allocation25_spill] sm:$0xff] }
 0x1b1   : > { %v3729_v32 = vadd.f32 %v1885_v29, %v1692_v11  ;;  %v3731_v12 = vadd.f32 %v1933_v34, %v1566_v39  ;;  %v1886_v7 = vadd.f32 %v3566_v3, %v1699_v17  ;;  %v1934_v42 = vadd.f32 %v3568_v19, %v1573_v59 }
 0x1b2   : > { %v1279_v15 = vpop.f32.mrb[96].mxu0  ;;  %v1392_v35 = vpop.f32.mrb[96].mxu1 }
 0x1b3   : > { %v3735_v47 = vadd.f32 %v1886_v7, %v1700_v0  ;;  %v1280_v8 = vadd.f32 %v1279_v15, %v4196_v6  ;;  %v1393_v23 = vadd.f32 %v1392_v35, %v4197_v60  ;;  %v1281_v28 = vpop.f32.mrb[97].mxu0  ;;  %v1394_v21 = vpop.f32.mrb[97].mxu1  ;;  %v3739_v5 = vadd.f32 %v1934_v42, %v1574_v58  ;;  %v4199_v42 = vld [vmem:[#allocation24_spill] sm:$0xff] }
 0x1b4   : > { %v1282_v18 = vadd.f32 %v1281_v28, %v4196_v6  ;;  %v1395_v37 = vadd.f32 %v1394_v21, %v4197_v60  ;;  %v1283_v3 = vpop.f32.mrb[98].mxu0  ;;  %v1396_v11 = vpop.f32.mrb[98].mxu1 }
 0x1b5   : > { %v1707_v39 = vmax.f32 %v1280_v8, 0.0  ;;  %v1581_v19 = vmax.f32 %v1393_v23, 0.0  ;;  %v1284_v22 = vadd.f32 %v1283_v3, %v4198_v62  ;;  %v1397_v29 = vadd.f32 %v1396_v11, %v3216_v40  ;;  %v1398_v34 = vpop.f32.mrb[99].mxu1  ;;  %v1285_v17 = vpop.f32.mrb[99].mxu0  ;;  %v4201_v3 = vld [vmem:[#allocation13_spill] sm:$0xff] }
 0x1b6   : > { %v1708_v59 = vmax.f32 %v1282_v18, 0.0  ;;  %v1582_v58 = vmax.f32 %v1395_v37, 0.0  ;;  %v1399_v7 = vadd.f32 %v1398_v34, %v3216_v40  ;;  %v1286_v23 = vadd.f32 %v1285_v17, %v4198_v62 }
 0x1b7   : > { %v1887_v0 = vadd.f32 %v3580_v25, %v1707_v39  ;;  %v1935_v15 = vadd.f32 %v4199_v42, %v1581_v19  ;;  %v1715_v35 = vmax.f32 %v1284_v22, 0.0  ;;  %v1589_v8 = vmax.f32 %v1397_v29, 0.0  ;;  %v4204_v25 = vld [vmem:[#allocation8_spill] sm:$0xff]  ;;  %v4205_v19 = vld [vmem:[#allocation10_spill] sm:$0xff] }
 0x1b8   : > { %v1590_v60 = vmax.f32 %v1399_v7, 0.0  ;;  %v1716_v37 = vmax.f32 %v1286_v23, 0.0 }
 0x1b9   : > { %v3751_v28 = vadd.f32 %v1887_v0, %v1708_v59  ;;  %v3753_v21 = vadd.f32 %v1935_v15, %v1582_v58  ;;  %v1888_v11 = vadd.f32 %v4201_v3, %v1715_v35  ;;  %v1936_v18 = vadd.f32 %v4202_v1, %v1589_v8  ;;  %v4206_v8 = vld [vmem:[#allocation9_spill] sm:$0xff] }
 0x1ba   : > { %v1289_v48 = vpop.f32.mrb[100].mxu0  ;;  %v1402_v40 = vpop.f32.mrb[100].mxu1 }
 0x1bb   : > { %4200 = vst [vmem:[#allocation27_spill] sm:$0xff] %v3753_v21  ;;  %v3757_v34 = vadd.f32 %v1936_v18, %v1590_v60  ;;  %v1290_v39 = vadd.f32 %v1289_v48, %v4204_v25  ;;  %v1403_v22 = vadd.f32 %v1402_v40, %v4205_v19  ;;  %v1291_v29 = vpop.f32.mrb[101].mxu0  ;;  %v1404_v7 = vpop.f32.mrb[101].mxu1  ;;  %v3761_v17 = vadd.f32 %v1888_v11, %v1716_v37  ;;  %v4210_v21 = vld [vmem:[#allocation26_spill] sm:$0xff] }
 0x1bc   : > { %v1292_v59 = vadd.f32 %v1291_v29, %v4204_v25  ;;  %v1405_v58 = vadd.f32 %v1404_v7, %v4205_v19  ;;  %v1293_v0 = vpop.f32.mrb[102].mxu0  ;;  %v1406_v42 = vpop.f32.mrb[102].mxu1  ;;  %v4207_v19 = vld [vmem:[#allocation14_spill] sm:$0xff] }
 0x1bd   : > { %4203 = vst [vmem:[#allocation21_spill] sm:$0xff] %v3757_v34  ;;  %v1723_v15 = vmax.f32 %v1290_v39, 0.0  ;;  %v1597_v35 = vmax.f32 %v1403_v22, 0.0  ;;  %v1294_v60 = vadd.f32 %v1293_v0, %v4206_v8  ;;  %v1408_v48 = vpop.f32.mrb[103].mxu1  ;;  %v1295_v23 = vpop.f32.mrb[103].mxu0  ;;  %v1407_v11 = vadd.f32 %v1406_v42, %v3236_v44 }
 0x1be   : > { %v1724_v3 = vmax.f32 %v1292_v59, 0.0  ;;  %v1598_v18 = vmax.f32 %v1405_v58, 0.0  ;;  %v1409_v37 = vadd.f32 %v1408_v48, %v3236_v44  ;;  %v1296_v55 = vadd.f32 %v1295_v23, %v4206_v8 }
 0x1bf   : > { %v1889_v40 = vadd.f32 %v3600_v43, %v1723_v15  ;;  %v1937_v29 = vadd.f32 %v4207_v19, %v1597_v35  ;;  %v1731_v7 = vmax.f32 %v1294_v60, 0.0  ;;  %v1605_v1 = vmax.f32 %v1407_v11, 0.0  ;;  %v4212_v43 = vld [vmem:[#allocation11_spill] sm:$0xff] }
 0x1c0   : > { %v1606_v39 = vmax.f32 %v1409_v37, 0.0  ;;  %v1732_v58 = vmax.f32 %v1296_v55, 0.0  ;;  %v4213_v35 = vld [vmem:[#allocation15_spill] sm:$0xff] }
 0x1c1   : > { %v3773_v22 = vadd.f32 %v1889_v40, %v1724_v3  ;;  %v3775_v0 = vadd.f32 %v1937_v29, %v1598_v18  ;;  %v1890_v59 = vadd.f32 %v4209_v61, %v1731_v7  ;;  %v1938_v42 = vadd.f32 %v4210_v21, %v1605_v1  ;;  %v4214_v1 = vld [vmem:[#allocation12_spill] sm:$0xff] }
 0x1c2   : > { %v1299_v34 = vpop.f32.mrb[104].mxu0  ;;  %v1412_v44 = vpop.f32.mrb[104].mxu1 }
 0x1c3   : > { %4208 = vst [vmem:[#allocation22_spill] sm:$0xff] %v3775_v0  ;;  %v3779_v48 = vadd.f32 %v1890_v59, %v1732_v58  ;;  %v1300_v15 = vadd.f32 %v1299_v34, %v4212_v43  ;;  %v1413_v60 = vadd.f32 %v1412_v44, %v4213_v35  ;;  %v1301_v23 = vpop.f32.mrb[105].mxu0  ;;  %v1414_v11 = vpop.f32.mrb[105].mxu1  ;;  %v3783_v37 = vadd.f32 %v1938_v42, %v1606_v39  ;;  %v4217_v59 = vld [vmem:[#allocation20_spill] sm:$0xff] }
 0x1c4   : > { %v1302_v3 = vadd.f32 %v1301_v23, %v4212_v43  ;;  %v1415_v18 = vadd.f32 %v1414_v11, %v4213_v35  ;;  %v1303_v61 = vpop.f32.mrb[106].mxu0  ;;  %v1416_v55 = vpop.f32.mrb[106].mxu1  ;;  %v4216_v43 = vld [vmem:[#allocation17_spill] sm:$0xff] }
 0x1c5   : > { %4211 = vst [vmem:[#allocation3_spill] sm:$0xff] %v3779_v48  ;;  %v1739_v40 = vmax.f32 %v1300_v15, 0.0  ;;  %v1613_v21 = vmax.f32 %v1413_v60, 0.0  ;;  %v1304_v19 = vadd.f32 %v1303_v61, %v4214_v1  ;;  %v1417_v29 = vadd.f32 %v1416_v55, %v3280_v10  ;;  %v1418_v7 = vpop.f32.mrb[107].mxu1  ;;  %v1305_v34 = vpop.f32.mrb[107].mxu0 }
 0x1c6   : > { %v1740_v58 = vmax.f32 %v1302_v3, 0.0  ;;  %v1614_v39 = vmax.f32 %v1415_v18, 0.0  ;;  %v1419_v42 = vadd.f32 %v1418_v7, %v3280_v10  ;;  %v1306_v11 = vadd.f32 %v1305_v34, %v4214_v1 }
 0x1c7   : > { %v1891_v44 = vadd.f32 %v3620_v51, %v1739_v40  ;;  %v1939_v35 = vadd.f32 %v3622_v4, %v1613_v21  ;;  %v1747_v23 = vmax.f32 %v1304_v19, 0.0  ;;  %v1621_v15 = vmax.f32 %v1417_v29, 0.0  ;;  %v4218_v51 = vld [vmem:[#allocation18_spill] sm:$0xff]  ;;  %v4219_v40 = vld [vmem:[#allocation23_spill] sm:$0xff] }
 0x1c8   : > { %v1622_v60 = vmax.f32 %v1419_v42, 0.0  ;;  %v1748_v18 = vmax.f32 %v1306_v11, 0.0 }
 0x1c9   : > { %v3795_v61 = vadd.f32 %v1891_v44, %v1740_v58  ;;  %v3797_v55 = vadd.f32 %v1939_v35, %v1614_v39  ;;  %v1892_v48 = vadd.f32 %v4216_v43, %v1747_v23  ;;  %v1940_v3 = vadd.f32 %v4217_v59, %v1621_v15  ;;  %v4220_v23 = vld [vmem:[#allocation19_spill] sm:$0xff] }
 0x1ca   : > { %v1309_v0 = vpop.f32.mrb[108].mxu0  ;;  %v1422_v10 = vpop.f32.mrb[108].mxu1 }
 0x1cb   : > { %4215 = vst [vmem:[#allocation4_spill] sm:$0xff] %v3797_v55  ;;  %v3801_v7 = vadd.f32 %v1940_v3, %v1622_v60  ;;  %v1310_v4 = vadd.f32 %v1309_v0, %v4218_v51  ;;  %v1423_v21 = vadd.f32 %v1422_v10, %v4219_v40  ;;  %v1311_v19 = vpop.f32.mrb[109].mxu0  ;;  %v1424_v29 = vpop.f32.mrb[109].mxu1  ;;  %v3805_v34 = vadd.f32 %v1892_v48, %v1748_v18 }
 0x1cc   : > { %v1312_v58 = vadd.f32 %v1311_v19, %v4218_v51  ;;  %v1425_v39 = vadd.f32 %v1424_v29, %v4219_v40  ;;  %v1313_v43 = vpop.f32.mrb[110].mxu0  ;;  %v1426_v42 = vpop.f32.mrb[110].mxu1 }
 0x1cd   : > { %v1755_v44 = vmax.f32 %v1310_v4, 0.0  ;;  %v1629_v35 = vmax.f32 %v1423_v21, 0.0  ;;  %v1314_v15 = vadd.f32 %v1313_v43, %v4220_v23  ;;  %v1315_v0 = vpop.f32.mrb[111].mxu0  ;;  %v1428_v60 = vpop.f32.mrb[111].mxu1  ;;  %v1427_v48 = vadd.f32 %v1426_v42, %v3389_v50 }
 0x1ce   : > { %v1756_v11 = vmax.f32 %v1312_v58, 0.0  ;;  %v1630_v3 = vmax.f32 %v1425_v39, 0.0  ;;  %v1316_v18 = vadd.f32 %v1315_v0, %v4220_v23  ;;  %v1429_v29 = vadd.f32 %v1428_v60, %v3389_v50 }
 0x1cf   : > { %v1893_v10 = vadd.f32 %v3640_v2, %v1755_v44  ;;  %v1941_v40 = vadd.f32 %v3642_v14, %v1629_v35  ;;  %v1763_v19 = vmax.f32 %v1314_v15, 0.0  ;;  %v1637_v59 = vmax.f32 %v1427_v48, 0.0 }
 0x1d0   : > { %v1764_v4 = vmax.f32 %v1316_v18, 0.0  ;;  %v1638_v39 = vmax.f32 %v1429_v29, 0.0 }
 0x1d1   : > { %v3817_v21 = vadd.f32 %v1893_v10, %v1756_v11  ;;  %v3819_v43 = vadd.f32 %v1941_v40, %v1630_v3  ;;  %v1894_v58 = vadd.f32 %v3646_v38, %v1763_v19  ;;  %v1942_v42 = vadd.f32 %v3648_v49, %v1637_v59 }
 0x1d2   : > { %v1432_v55 = vpop.f32.mrb[112].mxu1 }
 0x1d3   : > { %v3823_v0 = vadd.f32 %v1894_v58, %v1764_v4  ;;  %v1433_v2 = vadd.f32 %v1432_v55, %v3140_v20  ;;  %v1434_v14 = vpop.f32.mrb[113].mxu1  ;;  %v3826_v44 = vadd.f32 %v1942_v42, %v1638_v39 }
 0x1d4   : > { %v1435_v50 = vadd.f32 %v1434_v14, %v3140_v20  ;;  %v1436_v35 = vpop.f32.mrb[114].mxu1 }
 0x1d5   : > { %v1645_v15 = vmax.f32 %v1433_v2, 0.0  ;;  %v1437_v60 = vadd.f32 %v1436_v35, %v4195_v41  ;;  %v1438_v11 = vpop.f32.mrb[115].mxu1  ;;  %v2700_v38 = vpack.c.bf16 %v3826_v44, %v3819_v43  ;;  %v2094_v43 = vld [vmem:[%s4093_s3 + $0x20] sm:$0xff]  ;;  %v2097_v44 = vld [vmem:[%s4093_s3 + $0x38] sm:$0xff] }
 0x1d6   : > { %v1646_v3 = vmax.f32 %v1435_v50, 0.0  ;;  %v1439_v49 = vadd.f32 %v1438_v11, %v4195_v41 }
 0x1d7   : > { %v1943_v59 = vadd.f32 %v3663_v53, %v1645_v15  ;;  %v1653_v48 = vmax.f32 %v1437_v60, 0.0  ;;  %v4221_v15 = vpack.c.bf16 %v3669_v9, %v3665_v63 }
 0x1d8   : > { %v1654_v55 = vmax.f32 %v1439_v49, 0.0 }
 0x1d9   : > { %v1975_v18 = vadd.f32 %v1943_v59, %v1646_v3  ;;  %v1944_v10 = vadd.f32 %v3671_v36, %v1653_v48 }
 0x1da   : > { %v1442_v40 = vpop.f32.mrb[116].mxu1 }
 0x1db   : > { %v1976_v20 = vadd.f32 %v1944_v10, %v1654_v55  ;;  %v1443_v19 = vadd.f32 %v1442_v40, %v3156_v26  ;;  %v1444_v29 = vpop.f32.mrb[117].mxu1 }
 0x1dc   : > { %v1445_v4 = vadd.f32 %v1444_v29, %v3156_v26  ;;  %v1446_v58 = vpop.f32.mrb[118].mxu1 }
 0x1dd   : > { %v1661_v39 = vmax.f32 %v1443_v19, 0.0  ;;  %v1447_v42 = vadd.f32 %v1446_v58, %v3158_v27  ;;  %v1448_v2 = vpop.f32.mrb[119].mxu1  ;;  %v2670_v41 = vpack.c.bf16 %v1976_v20, %v1975_v18  ;;  %v4222_v19 = vpack.c.bf16 %v3695_v13, %v3687_v52 }
 0x1de   : > { %v1662_v14 = vmax.f32 %v1445_v4, 0.0  ;;  %v1449_v53 = vadd.f32 %v1448_v2, %v3158_v27 }
 0x1df   : > { %v1945_v50 = vadd.f32 %v3685_v16, %v1661_v39  ;;  %v1669_v35 = vmax.f32 %v1447_v42, 0.0  ;;  %2671 = vmatprep.subr.bf16.mxu0 %v2670_v41 }
 0x1e0   : > { %v1670_v36 = vmax.f32 %v1449_v53, 0.0  ;;  %2673 = vmatpush3.bf16.msra.mxu0 %v4221_v15 }
 0x1e1   : > { %v1977_v60 = vadd.f32 %v1945_v50, %v1662_v14  ;;  %v1946_v26 = vadd.f32 %v3691_v46, %v1669_v35 }
 0x1e2   : > { %v1452_v11 = vpop.f32.mrb[120].mxu1 }
 0x1e3   : > { %v1978_v3 = vadd.f32 %v1946_v26, %v1670_v36  ;;  %v1453_v49 = vadd.f32 %v1452_v11, %v3174_v30  ;;  %v1454_v59 = vpop.f32.mrb[121].mxu1  ;;  %v4223_v36 = vpack.c.bf16 %v3713_v45, %v3709_v57 }
 0x1e4   : > { %v1455_v48 = vadd.f32 %v1454_v59, %v3174_v30  ;;  %v1456_v27 = vpop.f32.mrb[122].mxu1 }
 0x1e5   : > { %v1677_v55 = vmax.f32 %v1453_v49, 0.0  ;;  %v1457_v16 = vadd.f32 %v1456_v27, %v3176_v31  ;;  %v1458_v18 = vpop.f32.mrb[123].mxu1  ;;  %v2674_v10 = vpack.c.bf16 %v1978_v3, %v1977_v60 }
 0x1e6   : > { %v1678_v40 = vmax.f32 %v1455_v48, 0.0  ;;  %v1459_v63 = vadd.f32 %v1458_v18, %v3176_v31  ;;  %v4224_v18 = vpack.c.bf16 %v3739_v5, %v3731_v12 }
 0x1e7   : > { %v1947_v9 = vadd.f32 %v3707_v54, %v1677_v55  ;;  %v1685_v20 = vmax.f32 %v1457_v16, 0.0  ;;  %2675 = vmatprep.subr.bf16.mxu0 %v2674_v10 }
 0x1e8   : > { %v1686_v46 = vmax.f32 %v1459_v63, 0.0  ;;  %2677 = vmatpush3.bf16.msra.mxu0 %v4222_v19 }
 0x1e9   : > { %v1979_v29 = vadd.f32 %v1947_v9, %v1678_v40  ;;  %v1948_v30 = vadd.f32 %v3717_v56, %v1685_v20 }
 0x1ea   : > { %v1462_v4 = vpop.f32.mrb[124].mxu1 }
 0x1eb   : > { %v1980_v58 = vadd.f32 %v1948_v30, %v1686_v46  ;;  %v1463_v39 = vadd.f32 %v1462_v4, %v3190_v24  ;;  %v1464_v42 = vpop.f32.mrb[125].mxu1 }
 0x1ec   : > { %v1465_v2 = vadd.f32 %v1464_v42, %v3190_v24  ;;  %v1466_v31 = vpop.f32.mrb[126].mxu1  ;;  %v4226_v42 = vld [vmem:[#allocation27_spill] sm:$0xff] }
 0x1ed   : > { %v1693_v41 = vmax.f32 %v1463_v39, 0.0  ;;  %v1467_v54 = vadd.f32 %v1466_v31, %v3192_v33  ;;  %v1468_v14 = vpop.f32.mrb[127].mxu1  ;;  %v2678_v53 = vpack.c.bf16 %v1980_v58, %v1979_v29  ;;  %v4225_v39 = vld [vmem:[#allocation21_spill] sm:$0xff] }
 0x1ee   : > { %v1694_v50 = vmax.f32 %v1465_v2, 0.0  ;;  %v1469_v52 = vadd.f32 %v1468_v14, %v3192_v33  ;;  %v4227_v2 = vpack.c.bf16 %v4225_v39, %v4226_v42  ;;  %v2109_v39 = vld [vmem:[%s4093_s3 + $0x98] sm:$0xff]  ;;  %v2108_v42 = vld [vmem:[%s4093_s3 + $0x90] sm:$0xff] }
 0x1ef   : > { %v1949_v13 = vadd.f32 %v3729_v32, %v1693_v41  ;;  %v1701_v35 = vmax.f32 %v1467_v54, 0.0  ;;  %2679 = vmatprep.subr.bf16.mxu0 %v2678_v53  ;;  %v4229_v53 = vld [vmem:[#allocation11_spill] sm:$0xff] }
 0x1f0   : > { %v1702_v56 = vmax.f32 %v1469_v52, 0.0  ;;  %2681 = vmatpush3.bf16.msra.mxu0 %v4223_v36 }
 0x1f1   : > { %v1981_v15 = vadd.f32 %v1949_v13, %v1694_v50  ;;  %v1950_v24 = vadd.f32 %v3735_v47, %v1701_v35 }
 0x1f2   : > { %v1472_v60 = vpop.f32.mrb[128].mxu1 }
 0x1f3   : > { %v1982_v26 = vadd.f32 %v1950_v24, %v1702_v56  ;;  %v1473_v11 = vadd.f32 %v1472_v60, %v4196_v6  ;;  %v1474_v3 = vpop.f32.mrb[129].mxu1 }
 0x1f4   : > { %v1475_v49 = vadd.f32 %v1474_v3, %v4196_v6  ;;  %v1476_v33 = vpop.f32.mrb[130].mxu1  ;;  %v4230_v3 = vld [vmem:[#allocation22_spill] sm:$0xff] }
 0x1f5   : > { %v1709_v59 = vmax.f32 %v1473_v11, 0.0  ;;  %v1477_v32 = vadd.f32 %v1476_v33, %v4198_v62  ;;  %v1478_v48 = vpop.f32.mrb[131].mxu1  ;;  %v2682_v27 = vpack.c.bf16 %v1982_v26, %v1981_v15 }
 0x1f6   : > { %v1710_v55 = vmax.f32 %v1475_v49, 0.0  ;;  %v1479_v57 = vadd.f32 %v1478_v48, %v4198_v62  ;;  %v4231_v49 = vpack.c.bf16 %v3783_v37, %v4230_v3 }
 0x1f7   : > { %v1951_v45 = vadd.f32 %v3751_v28, %v1709_v59  ;;  %v1717_v16 = vmax.f32 %v1477_v32, 0.0  ;;  %2683 = vmatprep.subr.bf16.mxu0 %v2682_v27 }
 0x1f8   : > { %v1718_v47 = vmax.f32 %v1479_v57, 0.0  ;;  %2685 = vmatpush3.bf16.msra.mxu0 %v4224_v18 }
 0x1f9   : > { %v1983_v10 = vadd.f32 %v1951_v45, %v1710_v55  ;;  %v1952_v6 = vadd.f32 %v3761_v17, %v1717_v16 }
 0x1fa   : > { %v1482_v40 = vpop.f32.mrb[132].mxu1 }
 0x1fb   : > { %v1984_v63 = vadd.f32 %v1952_v6, %v1718_v47  ;;  %v1483_v9 = vadd.f32 %v1482_v40, %v4204_v25  ;;  %v1484_v20 = vpop.f32.mrb[133].mxu1  ;;  %v4232_v40 = vld [vmem:[#allocation4_spill] sm:$0xff] }
 0x1fc   : > { %v1485_v46 = vadd.f32 %v1484_v20, %v4204_v25  ;;  %v1486_v62 = vpop.f32.mrb[134].mxu1  ;;  %v4228_v25 = vld [vmem:[#allocation3_spill] sm:$0xff] }
 0x1fd   : > { %v1725_v19 = vmax.f32 %v1483_v9, 0.0  ;;  %v1487_v28 = vadd.f32 %v1486_v62, %v4206_v8  ;;  %v1488_v29 = vpop.f32.mrb[135].mxu1  ;;  %v2686_v30 = vpack.c.bf16 %v1984_v63, %v1983_v10  ;;  %v4233_v63 = vpack.c.bf16 %v3801_v7, %v4232_v40  ;;  %v2092_v7 = vld [vmem:[%s4093_s3 + $0x10] sm:$0xff]  ;;  %v2099_v62 = vld [vmem:[%s4093_s3 + $0x48] sm:$0xff] }
 0x1fe   : > { %v1726_v4 = vmax.f32 %v1485_v46, 0.0  ;;  %v1489_v12 = vadd.f32 %v1488_v29, %v4206_v8  ;;  %v2100_v29 = vld [vmem:[%s4093_s3 + $0x50] sm:$0xff] }
 0x1ff   : > { %v1953_v5 = vadd.f32 %v3773_v22, %v1725_v19  ;;  %v1733_v58 = vmax.f32 %v1487_v28, 0.0  ;;  %2687 = vmatprep.subr.bf16.mxu0 %v2686_v30  ;;  %v2098_v19 = vld [vmem:[%s4093_s3 + $0x40] sm:$0xff]  ;;  %v2101_v28 = vld [vmem:[%s4093_s3 + $0x58] sm:$0xff]  ;;  %v2103_v30 = vld [vmem:[%s4093_s3 + $0x68] sm:$0xff] }
 0x200   : > { %v1734_v17 = vmax.f32 %v1489_v12, 0.0  ;;  %2689 = vmatpush3.bf16.msra.mxu0 %v4227_v2  ;;  %v2105_v12 = vld [vmem:[%s4093_s3 + $0x78] sm:$0xff]  ;;  %v2111_v2 = vld [vmem:[%s4093_s3 + $0xa8] sm:$0xff] }
 0x201   : > { %v1985_v31 = vadd.f32 %v1953_v5, %v1726_v4  ;;  %v1954_v41 = vadd.f32 %v4228_v25, %v1733_v58  ;;  %v2102_v4 = vld [vmem:[%s4093_s3 + $0x60] sm:$0xff]  ;;  %v2104_v5 = vld [vmem:[%s4093_s3 + $0x70] sm:$0xff]  ;;  %v2107_v58 = vld [vmem:[%s4093_s3 + $0x88] sm:$0xff] }
 0x202   : > { %v1492_v54 = vpop.f32.mrb[136].mxu1  ;;  %v2113_v25 = vld [vmem:[%s4093_s3 + $0xb8] sm:$0xff] }
 0x203   : > { %v1986_v14 = vadd.f32 %v1954_v41, %v1734_v17  ;;  %v1493_v50 = vadd.f32 %v1492_v54, %v4229_v53  ;;  %v1494_v52 = vpop.f32.mrb[137].mxu1  ;;  %v2106_v17 = vld [vmem:[%s4093_s3 + $0x80] sm:$0xff]  ;;  %v2112_v41 = vld [vmem:[%s4093_s3 + $0xb0] sm:$0xff]  ;;  %v2115_v54 = vld [vmem:[%s4093_s3 + $0xc8] sm:$0xff] }
 0x204   : > { %v1495_v13 = vadd.f32 %v1494_v52, %v4229_v53  ;;  %v1496_v8 = vpop.f32.mrb[138].mxu1  ;;  %v2117_v53 = vld [vmem:[%s4093_s3 + $0xd8] sm:$0xff]  ;;  %v2119_v52 = vld [vmem:[%s4093_s3 + $0xe8] sm:$0xff] }
 0x205   : > { %v1741_v35 = vmax.f32 %v1493_v50, 0.0  ;;  %v1497_v22 = vadd.f32 %v1496_v8, %v4214_v1  ;;  %v1498_v56 = vpop.f32.mrb[139].mxu1  ;;  %v2690_v36 = vpack.c.bf16 %v1986_v14, %v1985_v31  ;;  %v2110_v31 = vld [vmem:[%s4093_s3 + $0xa0] sm:$0xff]  ;;  %v2116_v50 = vld [vmem:[%s4093_s3 + $0xd0] sm:$0xff]  ;;  %v2121_v8 = vld [vmem:[%s4093_s3 + $0xf8] sm:$0xff] }
 0x206   : > { %v1742_v15 = vmax.f32 %v1495_v13, 0.0  ;;  %v1499_v24 = vadd.f32 %v1498_v56, %v4214_v1  ;;  %v2114_v14 = vld [vmem:[%s4093_s3 + $0xc0] sm:$0xff] }
 0x207   : > { %v1955_v60 = vadd.f32 %v3795_v61, %v1741_v35  ;;  %v1749_v26 = vmax.f32 %v1497_v22, 0.0  ;;  %2691 = vmatprep.subr.bf16.mxu0 %v2690_v36  ;;  %v2118_v13 = vld [vmem:[%s4093_s3 + $0xe0] sm:$0xff]  ;;  %v2120_v35 = vld [vmem:[%s4093_s3 + $0xf0] sm:$0xff] }
 0x208   : > { %v1750_v11 = vmax.f32 %v1499_v24, 0.0  ;;  %2693 = vmatpush3.bf16.msra.mxu0 %v4231_v49 }
 0x209   : > { %v1987_v33 = vadd.f32 %v1955_v60, %v1742_v15  ;;  %v1956_v59 = vadd.f32 %v3805_v34, %v1749_v26 }
 0x20a   : > { %v1502_v32 = vpop.f32.mrb[140].mxu1 }
 0x20b   : > { %v1988_v48 = vadd.f32 %v1956_v59, %v1750_v11  ;;  %v1503_v27 = vadd.f32 %v1502_v32, %v4218_v51  ;;  %v1504_v55 = vpop.f32.mrb[141].mxu1 }
 0x20c   : > { %v1505_v57 = vadd.f32 %v1504_v55, %v4218_v51  ;;  %v1506_v1 = vpop.f32.mrb[142].mxu1 }
 0x20d   : > { %v1757_v45 = vmax.f32 %v1503_v27, 0.0  ;;  %v1507_v61 = vadd.f32 %v1506_v1, %v4220_v23  ;;  %v1508_v16 = vpop.f32.mrb[143].mxu1  ;;  %v2694_v47 = vpack.c.bf16 %v1988_v48, %v1987_v33 }
 0x20e   : > { %v1758_v18 = vmax.f32 %v1505_v57, 0.0  ;;  %v1509_v37 = vadd.f32 %v1508_v16, %v4220_v23  ;;  %v2090_v23 = vld [vmem:[%s4093_s3] sm:$0xff] }
 0x20f   : > { %v1957_v10 = vadd.f32 %v3817_v21, %v1757_v45  ;;  %v1765_v6 = vmax.f32 %v1507_v61, 0.0  ;;  %2695 = vmatprep.subr.bf16.mxu0 %v2694_v47  ;;  %v2093_v21 = vld [vmem:[%s4093_s3 + $0x18] sm:$0xff] }
 0x210   : > { %v1766_v34 = vmax.f32 %v1509_v37, 0.0  ;;  %2697 = vmatpush3.bf16.msra.mxu0 %v4233_v63 }
 0x211   : > { %v1989_v9 = vadd.f32 %v1957_v10, %v1758_v18  ;;  %v1958_v51 = vadd.f32 %v3823_v0, %v1765_v6  ;;  %v2095_v0 = vld [vmem:[%s4093_s3 + $0x28] sm:$0xff] }
 0x213   : > { %v1990_v20 = vadd.f32 %v1958_v51, %v1766_v34 }
 0x215   : > { %v2698_v46 = vpack.c.bf16 %v1990_v20, %v1989_v9 }
 0x217   : > { %2699 = vmatprep.subr.bf16.mxu0 %v2698_v46 }
 0x218   : > { %2701 = vmatpush3.bf16.msra.mxu0 %v2700_v38  ;;  %v2096_v38 = vld [vmem:[%s4093_s3 + $0x30] sm:$0xff] }
 0x21b   : > { %2219 = vmatmul.mubr.f32.vlgmr.msra.gmra.mrb[112].mxu0 %v2090_v23 }
 0x21c   : > { %2223 = vmatprep.mubr.f32.mxu0 %v2093_v21 }
 0x21f   : > { %2224 = vmatmul.mubr.f32.gmra.mrb[114].mxu0 %v2092_v7 }
 0x220   : > { %2228 = vmatprep.mubr.f32.mxu0 %v2095_v0 }
 0x223   : > { %2229 = vmatmul.mubr.f32.gmra.mrb[116].mxu0 %v2094_v43 }
 0x224   : > { %2233 = vmatprep.mubr.f32.mxu0 %v2097_v44 }
 0x227   : > { %2234 = vmatmul.mubr.f32.gmra.mrb[118].mxu0 %v2096_v38 }
 0x228   : > { %2238 = vmatprep.mubr.f32.mxu0 %v2099_v62 }
 0x22b   : > { %2239 = vmatmul.mubr.f32.gmra.mrb[120].mxu0 %v2098_v19 }
 0x22c   : > { %2243 = vmatprep.mubr.f32.mxu0 %v2101_v28 }
 0x22f   : > { %2244 = vmatmul.mubr.f32.gmra.mrb[122].mxu0 %v2100_v29 }
 0x230   : > { %2248 = vmatprep.mubr.f32.mxu0 %v2103_v30 }
 0x233   : > { %2249 = vmatmul.mubr.f32.gmra.mrb[124].mxu0 %v2102_v4 }
 0x234   : > { %2253 = vmatprep.mubr.f32.mxu0 %v2105_v12 }
 0x237   : > { %2254 = vmatmul.mubr.f32.gmra.mrb[126].mxu0 %v2104_v5 }
 0x238   : > { %2258 = vmatprep.mubr.f32.mxu0 %v2107_v58  ;;  %v2347_v58 = vld [vmem:[%s4094_s4] sm:$0xff] }
 0x23b   : > { %2259 = vmatmul.mubr.f32.gmra.mrb[128].mxu0 %v2106_v17 }
 0x23c   : > { %2263 = vmatprep.mubr.f32.mxu0 %v2109_v39 }
 0x23f   : > { %2264 = vmatmul.mubr.f32.gmra.mrb[130].mxu0 %v2108_v42 }
 0x240   : > { %2268 = vmatprep.mubr.f32.mxu0 %v2111_v2  ;;  %v2348_v2 = vld [vmem:[%s4094_s4 + $0x8] sm:$0xff] }
 0x243   : > { %2269 = vmatmul.mubr.f32.gmra.mrb[132].mxu0 %v2110_v31 }
 0x244   : > { %2273 = vmatprep.mubr.f32.mxu0 %v2113_v25 }
 0x247   : > { %2274 = vmatmul.mubr.f32.gmra.mrb[134].mxu0 %v2112_v41 }
 0x248   : > { %2278 = vmatprep.mubr.f32.mxu0 %v2115_v54 }
 0x24b   : > { %2279 = vmatmul.mubr.f32.gmra.mrb[136].mxu0 %v2114_v14  ;;  %v2349_v14 = vld [vmem:[%s4094_s4 + $0x10] sm:$0xff] }
 0x24c   : > { %2283 = vmatprep.mubr.f32.mxu0 %v2117_v53 }
 0x24f   : > { %2284 = vmatmul.mubr.f32.gmra.mrb[138].mxu0 %v2116_v50 }
 0x250   : > { %2288 = vmatprep.mubr.f32.mxu0 %v2119_v52 }
 0x253   : > { %2289 = vmatmul.mubr.f32.gmra.mrb[140].mxu0 %v2118_v13 }
 0x254   : > { %2293 = vmatprep.mubr.f32.mxu0 %v2121_v8  ;;  %v2350_v8 = vld [vmem:[%s4094_s4 + $0x18] sm:$0xff] }
 0x257   : > { %2294 = vmatmul.mubr.f32.gmra.mrb[142].mxu0 %v2120_v35 }
 0x2ee   : > { %v2622_v22 = vpop.f32.mrb[112].mxu0 }
 0x2ef   : > { %v2623_v56 = vpop.f32.mrb[113].mxu0 }
 0x2f0   : > { %v2624_v36 = vadd.f32 %v2623_v56, %v2622_v22 }
 0x2f2   : > { %v2625_v15 = vpop.f32.mrb[114].mxu0  ;;  %2299 = vadd.xlane.f32.xlu0 %v2624_v36 }
 0x2f3   : > { %v2626_v24 = vpop.f32.mrb[115].mxu0 }
 0x2f4   : > { %v2627_v60 = vadd.f32 %v2626_v24, %v2625_v15  ;;  %v2351_v15 = vld [vmem:[%s4094_s4 + $0x20] sm:$0xff] }
 0x2f6   : > { %v2628_v26 = vpop.f32.mrb[116].mxu0  ;;  %2301 = vadd.xlane.f32.xlu1 %v2627_v60 }
 0x2f7   : > { %v2629_v11 = vpop.f32.mrb[117].mxu0 }
 0x2f8   : > { %v2630_v3 = vadd.f32 %v2629_v11, %v2628_v26 }
 0x2fa   : > { %v2631_v49 = vpop.f32.mrb[118].mxu0  ;;  %2303 = vadd.xlane.f32.xlu0 %v2630_v3  ;;  %v2352_v3 = vld [vmem:[%s4094_s4 + $0x28] sm:$0xff] }
 0x2fb   : > { %v2632_v33 = vpop.f32.mrb[119].mxu0 }
 0x2fc   : > { %v2633_v59 = vadd.f32 %v2632_v33, %v2631_v49 }
 0x2fe   : > { %v2634_v32 = vpop.f32.mrb[120].mxu0  ;;  %2305 = vadd.xlane.f32.xlu0 %v2633_v59 }
 0x2ff   : > { %v2635_v48 = vpop.f32.mrb[121].mxu0 }
 0x300   : > { %v2636_v27 = vadd.f32 %v2635_v48, %v2634_v32  ;;  %v2353_v48 = vld [vmem:[%s4094_s4 + $0x30] sm:$0xff] }
 0x302   : > { %v2637_v55 = vpop.f32.mrb[122].mxu0  ;;  %2307 = vadd.xlane.f32.xlu1 %v2636_v27 }
 0x303   : > { %v2638_v57 = vpop.f32.mrb[123].mxu0 }
 0x304   : > { %v2639_v1 = vadd.f32 %v2638_v57, %v2637_v55 }
 0x306   : > { %v2640_v45 = vpop.f32.mrb[124].mxu0  ;;  %2309 = vadd.xlane.f32.xlu0 %v2639_v1 }
 0x307   : > { %v2641_v61 = vpop.f32.mrb[125].mxu0 }
 0x308   : > { %v2642_v16 = vadd.f32 %v2641_v61, %v2640_v45  ;;  %v2354_v45 = vld [vmem:[%s4094_s4 + $0x38] sm:$0xff] }
 0x30a   : > { %v2643_v47 = vpop.f32.mrb[126].mxu0  ;;  %2311 = vadd.xlane.f32.xlu1 %v2642_v16 }
 0x30b   : > { %v2644_v18 = vpop.f32.mrb[127].mxu0 }
 0x30c   : > { %v2645_v37 = vadd.f32 %v2644_v18, %v2643_v47 }
 0x30e   : > { %v2646_v10 = vpop.f32.mrb[128].mxu0  ;;  %2313 = vadd.xlane.f32.xlu0 %v2645_v37  ;;  %v2355_v37 = vld [vmem:[%s4094_s4 + $0x40] sm:$0xff] }
 0x30f   : > { %v2647_v6 = vpop.f32.mrb[129].mxu0 }
 0x310   : > { %v2648_v34 = vadd.f32 %v2647_v6, %v2646_v10 }
 0x312   : > { %v2649_v40 = vpop.f32.mrb[130].mxu0  ;;  %2315 = vadd.xlane.f32.xlu1 %v2648_v34 }
 0x313   : > { %v2650_v63 = vpop.f32.mrb[131].mxu0 }
 0x314   : > { %v2651_v9 = vadd.f32 %v2650_v63, %v2649_v40  ;;  %v2356_v63 = vld [vmem:[%s4094_s4 + $0x48] sm:$0xff] }
 0x316   : > { %v2652_v51 = vpop.f32.mrb[132].mxu0  ;;  %2317 = vadd.xlane.f32.xlu0 %v2651_v9 }
 0x317   : > { %v2653_v20 = vpop.f32.mrb[133].mxu0 }
 0x318   : > { %v2654_v46 = vadd.f32 %v2653_v20, %v2652_v51 }
 0x31a   : > { %v2655_v23 = vpop.f32.mrb[134].mxu0  ;;  %2319 = vadd.xlane.f32.xlu1 %v2654_v46 }
 0x31b   : > { %v2656_v21 = vpop.f32.mrb[135].mxu0 }
 0x31c   : > { %v2657_v7 = vadd.f32 %v2656_v21, %v2655_v23  ;;  %v2357_v23 = vld [vmem:[%s4094_s4 + $0x50] sm:$0xff] }
 0x31e   : > { %v2658_v0 = vpop.f32.mrb[136].mxu0  ;;  %2321 = vadd.xlane.f32.xlu0 %v2657_v7 }
 0x31f   : > { %v2659_v43 = vpop.f32.mrb[137].mxu0 }
 0x320   : > { %v2660_v44 = vadd.f32 %v2659_v43, %v2658_v0 }
 0x322   : > { %v2661_v38 = vpop.f32.mrb[138].mxu0  ;;  %2323 = vadd.xlane.f32.xlu1 %v2660_v44  ;;  %v2358_v44 = vld [vmem:[%s4094_s4 + $0x58] sm:$0xff] }
 0x323   : > { %v2662_v62 = vpop.f32.mrb[139].mxu0 }
 0x324   : > { %v2663_v19 = vadd.f32 %v2662_v62, %v2661_v38 }
 0x326   : > { %v2664_v28 = vpop.f32.mrb[140].mxu0  ;;  %2325 = vadd.xlane.f32.xlu0 %v2663_v19 }
 0x327   : > { %v2665_v29 = vpop.f32.mrb[141].mxu0 }
 0x328   : > { %v2666_v30 = vadd.f32 %v2665_v29, %v2664_v28  ;;  %v2359_v29 = vld [vmem:[%s4094_s4 + $0x60] sm:$0xff] }
 0x32a   : > { %v2667_v4 = vpop.f32.mrb[142].mxu0  ;;  %2327 = vadd.xlane.f32.xlu1 %v2666_v30 }
 0x32b   : > { %v2668_v12 = vpop.f32.mrb[143].mxu0 }
 0x32c   : > { %v2669_v5 = vadd.f32 %v2668_v12, %v2667_v4 }
 0x32e   : > { %2329 = vadd.xlane.f32.xlu0 %v2669_v5 }
 0x37f   : > { %v2300_v17 = vpop.xlane.xlu0 %2299 }
 0x380   : > { %v2331_v39 = vmul.f32 0.0009765625, %v2300_v17 }
 0x382   : > { %v2363_v42 = vadd.f32 %v2347_v58, %v2331_v39  ;;  %v2360_v58 = vld [vmem:[%s4094_s4 + $0x68] sm:$0xff] }
 0x383   : > { %v2302_v31 = vpop.xlane.xlu1 %2301 }
 0x384   : > { %v2379_v25 = vmax.f32 %v2363_v42, 0.0  ;;  %v2332_v41 = vmul.f32 0.0009765625, %v2302_v31  ;;  %v2361_v31 = vld [vmem:[%s4094_s4 + $0x70] sm:$0xff] }
 0x386   : > { %2396 = vst.msk [vmem:[%s4002_s7] sm:$0xff] %vm2395_vm1, %v2379_v25  ;;  %v2364_v54 = vadd.f32 %v2348_v2, %v2332_v41 }
 0x387   : > { %v2304_v53 = vpop.xlane.xlu0 %2303 }
 0x388   : > { %v2380_v50 = vmax.f32 %v2364_v54, 0.0  ;;  %v2333_v52 = vmul.f32 0.0009765625, %v2304_v53  ;;  %v2362_v53 = vld [vmem:[%s4094_s4 + $0x78] sm:$0xff] }
 0x38a   : > { %2397 = vst.msk [vmem:[%s4002_s7 + $0x8] sm:$0xff] %vm2395_vm1, %v2380_v50  ;;  %v2365_v13 = vadd.f32 %v2349_v14, %v2333_v52 }
 0x38b   : > { %v2306_v35 = vpop.xlane.xlu0 %2305 }
 0x38c   : > { %v2381_v22 = vmax.f32 %v2365_v13, 0.0  ;;  %v2334_v56 = vmul.f32 0.0009765625, %v2306_v35 }
 0x38e   : > { %2398 = vst.msk [vmem:[%s4002_s7 + $0x10] sm:$0xff] %vm2395_vm1, %v2381_v22  ;;  %v2366_v36 = vadd.f32 %v2350_v8, %v2334_v56 }
 0x38f   : > { %v2308_v24 = vpop.xlane.xlu1 %2307 }
 0x390   : > { %v2382_v60 = vmax.f32 %v2366_v36, 0.0  ;;  %v2335_v26 = vmul.f32 0.0009765625, %v2308_v24 }
 0x392   : > { %2399 = vst.msk [vmem:[%s4002_s7 + $0x18] sm:$0xff] %vm2395_vm1, %v2382_v60  ;;  %v2367_v11 = vadd.f32 %v2351_v15, %v2335_v26 }
 0x393   : > { %v2310_v49 = vpop.xlane.xlu0 %2309 }
 0x394   : > { %v2383_v33 = vmax.f32 %v2367_v11, 0.0  ;;  %v2336_v59 = vmul.f32 0.0009765625, %v2310_v49 }
 0x396   : > { %2400 = vst.msk [vmem:[%s4002_s7 + $0x20] sm:$0xff] %vm2395_vm1, %v2383_v33  ;;  %v2368_v32 = vadd.f32 %v2352_v3, %v2336_v59 }
 0x397   : > { %v2312_v27 = vpop.xlane.xlu1 %2311 }
 0x398   : > { %v2384_v55 = vmax.f32 %v2368_v32, 0.0  ;;  %v2337_v57 = vmul.f32 0.0009765625, %v2312_v27 }
 0x39a   : > { %2401 = vst.msk [vmem:[%s4002_s7 + $0x28] sm:$0xff] %vm2395_vm1, %v2384_v55  ;;  %v2369_v1 = vadd.f32 %v2353_v48, %v2337_v57 }
 0x39b   : > { %v2314_v61 = vpop.xlane.xlu0 %2313 }
 0x39c   : > { %v2385_v16 = vmax.f32 %v2369_v1, 0.0  ;;  %v2338_v47 = vmul.f32 0.0009765625, %v2314_v61 }
 0x39e   : > { %2402 = vst.msk [vmem:[%s4002_s7 + $0x30] sm:$0xff] %vm2395_vm1, %v2385_v16  ;;  %v2370_v18 = vadd.f32 %v2354_v45, %v2338_v47 }
 0x39f   : > { %v2316_v10 = vpop.xlane.xlu1 %2315 }
 0x3a0   : > { %v2386_v6 = vmax.f32 %v2370_v18, 0.0  ;;  %v2339_v34 = vmul.f32 0.0009765625, %v2316_v10 }
 0x3a2   : > { %2403 = vst.msk [vmem:[%s4002_s7 + $0x38] sm:$0xff] %vm2395_vm1, %v2386_v6  ;;  %v2371_v40 = vadd.f32 %v2355_v37, %v2339_v34 }
 0x3a3   : > { %v2318_v9 = vpop.xlane.xlu0 %2317 }
 0x3a4   : > { %v2387_v51 = vmax.f32 %v2371_v40, 0.0  ;;  %v2340_v20 = vmul.f32 0.0009765625, %v2318_v9 }
 0x3a6   : > { %2404 = vst.msk [vmem:[%s4002_s7 + $0x40] sm:$0xff] %vm2395_vm1, %v2387_v51  ;;  %v2372_v46 = vadd.f32 %v2356_v63, %v2340_v20 }
 0x3a7   : > { %v2320_v21 = vpop.xlane.xlu1 %2319 }
 0x3a8   : > { %v2388_v7 = vmax.f32 %v2372_v46, 0.0  ;;  %v2341_v0 = vmul.f32 0.0009765625, %v2320_v21 }
 0x3aa   : > { %2405 = vst.msk [vmem:[%s4002_s7 + $0x48] sm:$0xff] %vm2395_vm1, %v2388_v7  ;;  %v2373_v43 = vadd.f32 %v2357_v23, %v2341_v0 }
 0x3ab   : > { %v2322_v38 = vpop.xlane.xlu0 %2321 }
 0x3ac   : > { %v2389_v62 = vmax.f32 %v2373_v43, 0.0  ;;  %v2342_v19 = vmul.f32 0.0009765625, %v2322_v38 }
 0x3ae   : > { %2406 = vst.msk [vmem:[%s4002_s7 + $0x50] sm:$0xff] %vm2395_vm1, %v2389_v62  ;;  %v2374_v28 = vadd.f32 %v2358_v44, %v2342_v19 }
 0x3af   : > { %v2324_v30 = vpop.xlane.xlu1 %2323 }
 0x3b0   : > { %v2390_v4 = vmax.f32 %v2374_v28, 0.0  ;;  %v2343_v12 = vmul.f32 0.0009765625, %v2324_v30 }
 0x3b2   : > { %2407 = vst.msk [vmem:[%s4002_s7 + $0x58] sm:$0xff] %vm2395_vm1, %v2390_v4  ;;  %v2375_v5 = vadd.f32 %v2359_v29, %v2343_v12 }
 0x3b3   : > { %v2326_v17 = vpop.xlane.xlu0 %2325 }
 0x3b4   : > { %v2391_v39 = vmax.f32 %v2375_v5, 0.0  ;;  %v2344_v42 = vmul.f32 0.0009765625, %v2326_v17 }
 0x3b6   : > { %2408 = vst.msk [vmem:[%s4002_s7 + $0x60] sm:$0xff] %vm2395_vm1, %v2391_v39  ;;  %v2376_v2 = vadd.f32 %v2360_v58, %v2344_v42 }
 0x3b7   : > { %v2328_v25 = vpop.xlane.xlu1 %2327 }
 0x3b8   : > { %v2392_v41 = vmax.f32 %v2376_v2, 0.0  ;;  %v2345_v54 = vmul.f32 0.0009765625, %v2328_v25 }
 0x3ba   : > { %2409 = vst.msk [vmem:[%s4002_s7 + $0x68] sm:$0xff] %vm2395_vm1, %v2392_v41  ;;  %v2377_v14 = vadd.f32 %v2361_v31, %v2345_v54 }
 0x3bb   : > { %v2330_v50 = vpop.xlane.xlu0 %2329 }
 0x3bc   : > { %v2393_v52 = vmax.f32 %v2377_v14, 0.0  ;;  %v2346_v13 = vmul.f32 0.0009765625, %v2330_v50 }
 0x3be   : > { %2410 = vst.msk [vmem:[%s4002_s7 + $0x70] sm:$0xff] %vm2395_vm1, %v2393_v52  ;;  %v2378_v8 = vadd.f32 %v2362_v53, %v2346_v13 }
 0x3c0   : > { %v2394_v35 = vmax.f32 %v2378_v8, 0.0 }
 0x3c2   : > { %2411 = vst.msk [vmem:[%s4002_s7 + $0x78] sm:$0xff] %vm2395_vm1, %v2394_v35 }
 0x3c3 PF: > { %s15_s20 = sadd.s32 1, %s2771_s20   ;;  %s4234_s18 = smov %s2767_s19 }
 0x3c4   : > { %p12_p5 = scmp.ge.s32.totalorder %s15_s20, 4   ;;  %s4235_s19 = smov %s4237_s21 }
 0x3c6   :  { %14 = sbr.rel (!%p12_p5) target bundleno = 2 (0x2), region = 78 }

</bundles_post_ra>
